<compile_context>
chip_gen: v5e
topology: v5e:2x2
jax: 0.10.0
libtpu: 0.0.40
codegen_flags: <defaults>
</compile_context>

<pallas_src>
import numpy as np
import jax
import jax.numpy as jnp
from jax.experimental import pallas as pl
from jax.experimental.pallas import tpu as pltpu

# ---- deterministic "parameters" (same as cv2.getGaussianKernel(51, 0)) ----
RADIUS = 50
KSIZE = RADIUS + 1 if RADIUS % 2 == 0 else RADIUS   # 51 (module bumps even radius)
PAD = KSIZE // 2                                    # 25

# bf16 MXU operands for the {0,1}-mask blur (inputs exact in bf16, f32
# accumulation).  Worst-case shift of the blend weight ~5e-3 -> ~1e-3 on the
# output.  Flip to False for strict f32 parity with the PyTorch reference.
MASK_BLUR_BF16 = True


def _gaussian_kernel_1d(ksize, sigma):
    # cv2.getGaussianKernel: sigma<=0 -> 0.3*((ksize-1)*0.5 - 1) + 0.8
    if sigma <= 0:
        sigma = 0.3 * ((ksize - 1) * 0.5 - 1) + 0.8
    xs = np.arange(ksize, dtype=np.float64) - (ksize - 1) / 2.0
    g = np.exp(-(xs * xs) / (2.0 * sigma * sigma))
    return g / g.sum()


_G1D = _gaussian_kernel_1d(KSIZE, 0)


def _reflect101(q, n):
    # F.pad(mode='reflect') / cv2 BORDER_REFLECT_101 index mapping (PAD < n).
    if q < 0:
        q = -q
    if q >= n:
        q = 2 * (n - 1) - q
    return q


def _conv_matrix(n):
    """(n, n) matrix M so that (M @ x) applies the 51-tap Gaussian with
    reflect-101 boundary handling along an axis of length n."""
    assert n > PAD, "reflect padding requires spatial dims > 25"
    M = np.zeros((n, n), np.float64)
    for i in range(n):
        for k in range(KSIZE):
            M[i, _reflect101(i + k - PAD, n)] += _G1D[k]
    return M.astype(np.float32)


def _tpu_params():
    """(physical VMEM bytes, #TensorCores) with conservative fallbacks."""
    vmem_cap = 64 * 1024 * 1024          # safe lower bound (v7x per-TC VMEM)
    n_tc = 1
    try:
        vmem_cap = int(pltpu.get_tpu_info().vmem_capacity_bytes)
    except Exception:
        pass
    try:
        if "v7" in jax.devices()[0].device_kind.lower():
            n_tc = 2                     # v7x: two TensorCores per chip
    except Exception:
        pass
    return vmem_cap, n_tc


def _pick_tile(bc, h, w, budget_bytes, n_tc):
    """Images per grid block.  tile*w must be a multiple of 128 (lane-dense,
    unmasked stores) unless tile == bc (block spans the full last dim)."""
    divs = [d for d in range(1, bc + 1) if bc % d == 0]
    allowed = [d for d in divs if d == bc or (d * w) % 128 == 0]

    def fits(d):
        blk = d * h * w * 4                    # one f32 copy of the block
        mats = 6 * h * h + 6 * (d * w) ** 2    # V + blockdiag H^T (f32 + bf16 temps)
        # ~10 live block-sized values: 2x in + 2x out pipeline buffers plus the
        # blur/residual/mask/sharp/soft SSA temporaries.
        return 10 * blk + mats <= budget_bytes

    feas = [d for d in allowed if fits(d)] or [bc]

    def score(d):
        steps = bc // d
        lane_fill = min(d * w, 256)            # MXU N / lane fill saturates ~256
        if n_tc >= 2:
            # v7x: both cores need work; even step count avoids a tail step.
            return (steps >= n_tc, steps % n_tc == 0, lane_fill, d)
        return (lane_fill, d)                  # single TC: biggest useful tile

    return max(feas, key=score)


def _make_kernel(weight, thr, clip_lo, clip_hi, mask_blur_bf16):
    def kernel(x_ref, v_ref, ht_ref, o_ref):
        xb = x_ref[...]      # (h, tile*w) f32, images packed along the lane axis
        V = v_ref[...]       # (h, h) reflect-baked vertical Gaussian
        HT = ht_ref[...]     # (tile*w, tile*w) block-diagonal horizontal Gaussian^T

        # ---- Gaussian blur of the image: two full-width f32 MXU matmuls ----
        blur = jnp.dot(jnp.dot(V, xb, preferred_element_type=jnp.float32), HT,
                       preferred_element_type=jnp.float32)

        residual = xb - blur
        # |residual| * 255 > threshold  <=>  |residual| > threshold/255
        mask = (jnp.abs(residual) > thr).astype(jnp.float32)
        sharp = jnp.clip(xb + weight * residual, clip_lo, clip_hi)

        # ---- Gaussian blur of the {0,1} mask (soft_mask) ----
        if mask_blur_bf16:
            m1 = jnp.dot(V.astype(jnp.bfloat16), mask.astype(jnp.bfloat16),
                         preferred_element_type=jnp.float32).astype(jnp.bfloat16)
            soft = jnp.dot(m1, HT.astype(jnp.bfloat16),
                           preferred_element_type=jnp.float32)
        else:
            soft = jnp.dot(jnp.dot(V, mask, preferred_element_type=jnp.float32),
                           HT, preferred_element_type=jnp.float32)

        # soft*sharp + (1-soft)*x  ==  x + soft*(sharp - x)
        o_ref[...] = xb + soft * (sharp - xb)

    return kernel


def usm_sharp(img, weight=0.5, threshold=10.0, clip_range=(0.0, 255.0)):
    """Same math as the given PyTorch USMSharp.forward (which clips `sharp` to
    [0, 255]).  Pass clip_range=(0.0, 1.0) for the upstream BasicSR convention
    on [0, 1]-normalised images."""
    b, c, h, w = img.shape
    assert h > PAD and w > PAD, "reflect padding requires spatial dims > 25"
    bc = b * c

    vmem_cap, n_tc = _tpu_params()
    vmem_limit = int(vmem_cap * 0.85)          # ~54 MiB v7x, ~108 MiB v5e/v6e
    tile = _pick_tile(bc, h, w, budget_bytes=vmem_limit // 2, n_tc=n_tc)
    n_steps = bc // tile
    tw = tile * w

    # Pack images along the lane axis: (bc, h, w) -> (h, bc*w).
    x = jnp.transpose(img.reshape(bc, h, w).astype(jnp.float32), (1, 0, 2))
    x = x.reshape(h, bc * w)

    V = jnp.asarray(_conv_matrix(h))                                   # (h, h)
    HTbd = jnp.asarray(np.kron(np.eye(tile, dtype=np.float32),
                               _conv_matrix(w).T).astype(np.float32))  # (tw, tw)

    kernel = _make_kernel(float(weight), float(threshold) / 255.0,
                          float(clip_range[0]), float(clip_range[1]),
                          MASK_BLUR_BF16)

    def _run(single_buffer_consts):
        const_kw = ({"pipeline_mode": pl.Buffered(1)}
                    if single_buffer_consts else {})
        out = pl.pallas_call(
            kernel,
            out_shape=jax.ShapeDtypeStruct((h, bc * w), jnp.float32),
            grid=(n_steps,),
            in_specs=[
                pl.BlockSpec((h, tw), lambda g: (0, g)),
                pl.BlockSpec((h, h), lambda g: (0, 0), **const_kw),   # V (const)
                pl.BlockSpec((tw, tw), lambda g: (0, 0), **const_kw), # H^T (const)
            ],
            out_specs=pl.BlockSpec((h, tw), lambda g: (0, g)),
            compiler_params=pltpu.CompilerParams(
                dimension_semantics=("parallel",),
                vmem_limit_bytes=vmem_limit),
        )(x, V, HTbd)
        return jax.block_until_ready(out)

    # V / H^T are grid-invariant, so single-buffer them to halve their VMEM
    # footprint; fall back to default double buffering if this JAX build
    # rejects buffer_count=1.
    try:
        out = _run(True)
    except Exception:
        out = _run(False)

    return out.reshape(h, bc, w).transpose(1, 0, 2).reshape(b, c, h, w)


if __name__ == "__main__":
    key = jax.random.PRNGKey(0)
    # Spatial dims must exceed the 25-pixel reflect pad of the 51-tap kernel,
    # so use 32x32 (the smallest "nice" size > 25).  Values in [0, 1].
    img = jax.random.uniform(key, (2, 4, 32, 32), jnp.float32)
    out = usm_sharp(img, weight=0.5, threshold=10.0)
    jax.block_until_ready(out)
    assert out.shape == img.shape and out.dtype == jnp.float32
    assert bool(jnp.all(jnp.isfinite(out)))
    print("KERNEL_OK")
</pallas_src>

<mosaic_0001>
module attributes {stable_mosaic.version = 11 : i64} {
  func.func @kernel(%arg0: i32, %arg1: memref<32x256xf32, #tpu.memory_space<vmem>>, %arg2: memref<32x32xf32, #tpu.memory_space<vmem>>, %arg3: memref<256x256xf32, #tpu.memory_space<vmem>>, %arg4: memref<32x256xf32, #tpu.memory_space<vmem>>) attributes {dimension_semantics = [#tpu.dimension_semantics<parallel>], iteration_bounds = array<i64: 1>, scalar_prefetch = 0 : i64, scratch_operands = 0 : i64, tpu.core_type = #tpu.core_type<tc>, window_params = [{transform_indices = @transform_0, window_bounds = array<i64: 32, 256>}, {pipeline_mode = #tpu.pipeline_mode<synchronous>, transform_indices = @transform_1, window_bounds = array<i64: 32, 32>}, {pipeline_mode = #tpu.pipeline_mode<synchronous>, transform_indices = @transform_2, window_bounds = array<i64: 256, 256>}, {transform_indices = @transform_3, window_bounds = array<i64: 32, 256>}]} {
    %c0 = arith.constant 0 : index
    %c0_0 = arith.constant 0 : index
    %0 = vector.load %arg1[%c0, %c0_0] : memref<32x256xf32, #tpu.memory_space<vmem>>, vector<32x256xf32>
    %c0_1 = arith.constant 0 : index
    %c0_2 = arith.constant 0 : index
    %1 = vector.load %arg2[%c0_1, %c0_2] : memref<32x32xf32, #tpu.memory_space<vmem>>, vector<32x32xf32>
    %c0_3 = arith.constant 0 : index
    %c0_4 = arith.constant 0 : index
    %2 = vector.load %arg3[%c0_3, %c0_4] : memref<256x256xf32, #tpu.memory_space<vmem>>, vector<256x256xf32>
    %cst = arith.constant dense<0.000000e+00> : vector<32x256xf32>
    %3 = tpu.matmul %1, %0, %cst {dimension_numbers = #tpu.dot_dimension_numbers<[1], [0], [0], [1], [0, 0, 1, 1], [], []>} : vector<32x32xf32>, vector<32x256xf32>, vector<32x256xf32> -> vector<32x256xf32>
    %cst_5 = arith.constant dense<0.000000e+00> : vector<32x256xf32>
    %4 = tpu.matmul %3, %2, %cst_5 {dimension_numbers = #tpu.dot_dimension_numbers<[1], [0], [0], [1], [0, 0, 1, 1], [], []>} : vector<32x256xf32>, vector<256x256xf32>, vector<32x256xf32> -> vector<32x256xf32>
    %5 = arith.subf %0, %4 : vector<32x256xf32>
    %6 = math.absf %5 : vector<32x256xf32>
    %cst_6 = arith.constant 0.0392156877 : f32
    %7 = vector.broadcast %cst_6 : f32 to vector<32x256xf32>
    %8 = arith.cmpf ogt, %6, %7 : vector<32x256xf32>
    %9 = arith.extui %8 : vector<32x256xi1> to vector<32x256xi32>
    %10 = arith.sitofp %9 : vector<32x256xi32> to vector<32x256xf32>
    %cst_7 = arith.constant 5.000000e-01 : f32
    %11 = vector.broadcast %cst_7 : f32 to vector<32x256xf32>
    %12 = arith.mulf %11, %5 : vector<32x256xf32>
    %13 = arith.addf %0, %12 : vector<32x256xf32>
    %cst_8 = arith.constant 0.000000e+00 : f32
    %cst_9 = arith.constant 2.550000e+02 : f32
    %14 = vector.broadcast %cst_8 : f32 to vector<32x256xf32>
    %15 = arith.maximumf %14, %13 : vector<32x256xf32>
    %16 = vector.broadcast %cst_9 : f32 to vector<32x256xf32>
    %17 = arith.minimumf %16, %15 : vector<32x256xf32>
    %18 = arith.truncf %1 : vector<32x32xf32> to vector<32x32xbf16>
    %19 = arith.truncf %10 : vector<32x256xf32> to vector<32x256xbf16>
    %cst_10 = arith.constant dense<0.000000e+00> : vector<32x256xf32>
    %20 = tpu.matmul %18, %19, %cst_10 {dimension_numbers = #tpu.dot_dimension_numbers<[1], [0], [0], [1], [0, 0, 1, 1], [], []>} : vector<32x32xbf16>, vector<32x256xbf16>, vector<32x256xf32> -> vector<32x256xf32>
    %21 = arith.truncf %20 : vector<32x256xf32> to vector<32x256xbf16>
    %22 = arith.truncf %2 : vector<256x256xf32> to vector<256x256xbf16>
    %cst_11 = arith.constant dense<0.000000e+00> : vector<32x256xf32>
    %23 = tpu.matmul %21, %22, %cst_11 {dimension_numbers = #tpu.dot_dimension_numbers<[1], [0], [0], [1], [0, 0, 1, 1], [], []>} : vector<32x256xbf16>, vector<256x256xbf16>, vector<32x256xf32> -> vector<32x256xf32>
    %24 = arith.subf %17, %0 : vector<32x256xf32>
    %25 = arith.mulf %23, %24 : vector<32x256xf32>
    %26 = arith.addf %0, %25 : vector<32x256xf32>
    %c0_12 = arith.constant 0 : index
    %c0_13 = arith.constant 0 : index
    %27 = vector.load %arg4[%c0_12, %c0_13] : memref<32x256xf32, #tpu.memory_space<vmem>>, vector<32x256xf32>
    tpu.vector_store %arg4[%c0_12, %c0_13], %26 {strides = array<i32>} : memref<32x256xf32, #tpu.memory_space<vmem>>, vector<32x256xf32>,
    return
  }
  func.func @transform_0(%arg0: i32) -> (i32, i32) {
    %c0_i32 = arith.constant 0 : i32
    %c0_i32_0 = arith.constant 0 : i32
    return %c0_i32, %arg0 : i32, i32
  }
  func.func @transform_1(%arg0: i32) -> (i32, i32) {
    %c0_i32 = arith.constant 0 : i32
    %c0_i32_0 = arith.constant 0 : i32
    %c0_i32_1 = arith.constant 0 : i32
    return %c0_i32, %c0_i32_0 : i32, i32
  }
  func.func @transform_2(%arg0: i32) -> (i32, i32) {
    %c0_i32 = arith.constant 0 : i32
    %c0_i32_0 = arith.constant 0 : i32
    %c0_i32_1 = arith.constant 0 : i32
    return %c0_i32, %c0_i32_0 : i32, i32
  }
  func.func @transform_3(%arg0: i32) -> (i32, i32) {
    %c0_i32 = arith.constant 0 : i32
    %c0_i32_0 = arith.constant 0 : i32
    return %c0_i32, %arg0 : i32, i32
  }
}

module attributes {stable_mosaic.version = 11 : i64} {
  func.func @kernel(%arg0: i32, %arg1: memref<32x256xf32, #tpu.memory_space<vmem>>, %arg2: memref<32x32xf32, #tpu.memory_space<vmem>>, %arg3: memref<256x256xf32, #tpu.memory_space<vmem>>, %arg4: memref<32x256xf32, #tpu.memory_space<vmem>>) attributes {dimension_semantics = [#tpu.dimension_semantics<parallel>], iteration_bounds = array<i64: 1>, scalar_prefetch = 0 : i64, scratch_operands = 0 : i64, tpu.core_type = #tpu.core_type<tc>, window_params = [{transform_indices = @transform_0, window_bounds = array<i64: 32, 256>}, {pipeline_mode = #tpu.pipeline_mode<synchronous>, transform_indices = @transform_1, window_bounds = array<i64: 32, 32>}, {pipeline_mode = #tpu.pipeline_mode<synchronous>, transform_indices = @transform_2, window_bounds = array<i64: 256, 256>}, {transform_indices = @transform_3, window_bounds = array<i64: 32, 256>}]} {
    %c0 = arith.constant 0 : index
    %c0_0 = arith.constant 0 : index
    %0 = vector.load %arg1[%c0, %c0_0] : memref<32x256xf32, #tpu.memory_space<vmem>>, vector<32x256xf32>
    %c0_1 = arith.constant 0 : index
    %c0_2 = arith.constant 0 : index
    %1 = vector.load %arg2[%c0_1, %c0_2] : memref<32x32xf32, #tpu.memory_space<vmem>>, vector<32x32xf32>
    %c0_3 = arith.constant 0 : index
    %c0_4 = arith.constant 0 : index
    %2 = vector.load %arg3[%c0_3, %c0_4] : memref<256x256xf32, #tpu.memory_space<vmem>>, vector<256x256xf32>
    %cst = arith.constant dense<0.000000e+00> : vector<32x256xf32>
    %3 = tpu.matmul %1, %0, %cst {dimension_numbers = #tpu.dot_dimension_numbers<[1], [0], [0], [1], [0, 0, 1, 1], [], []>} : vector<32x32xf32>, vector<32x256xf32>, vector<32x256xf32> -> vector<32x256xf32>
    %cst_5 = arith.constant dense<0.000000e+00> : vector<32x256xf32>
    %4 = tpu.matmul %3, %2, %cst_5 {dimension_numbers = #tpu.dot_dimension_numbers<[1], [0], [0], [1], [0, 0, 1, 1], [], []>} : vector<32x256xf32>, vector<256x256xf32>, vector<32x256xf32> -> vector<32x256xf32>
    %5 = arith.subf %0, %4 : vector<32x256xf32>
    %6 = math.absf %5 : vector<32x256xf32>
    %cst_6 = arith.constant 0.0392156877 : f32
    %7 = vector.broadcast %cst_6 : f32 to vector<32x256xf32>
    %8 = arith.cmpf ogt, %6, %7 : vector<32x256xf32>
    %9 = arith.extui %8 : vector<32x256xi1> to vector<32x256xi32>
    %10 = arith.sitofp %9 : vector<32x256xi32> to vector<32x256xf32>
    %cst_7 = arith.constant 5.000000e-01 : f32
    %11 = vector.broadcast %cst_7 : f32 to vector<32x256xf32>
    %12 = arith.mulf %11, %5 : vector<32x256xf32>
    %13 = arith.addf %0, %12 : vector<32x256xf32>
    %cst_8 = arith.constant 0.000000e+00 : f32
    %cst_9 = arith.constant 2.550000e+02 : f32
    %14 = vector.broadcast %cst_8 : f32 to vector<32x256xf32>
    %15 = arith.maximumf %14, %13 : vector<32x256xf32>
    %16 = vector.broadcast %cst_9 : f32 to vector<32x256xf32>
    %17 = arith.minimumf %16, %15 : vector<32x256xf32>
    %18 = arith.truncf %1 : vector<32x32xf32> to vector<32x32xbf16>
    %19 = arith.truncf %10 : vector<32x256xf32> to vector<32x256xbf16>
    %cst_10 = arith.constant dense<0.000000e+00> : vector<32x256xf32>
    %20 = tpu.matmul %18, %19, %cst_10 {dimension_numbers = #tpu.dot_dimension_numbers<[1], [0], [0], [1], [0, 0, 1, 1], [], []>} : vector<32x32xbf16>, vector<32x256xbf16>, vector<32x256xf32> -> vector<32x256xf32>
    %21 = arith.truncf %20 : vector<32x256xf32> to vector<32x256xbf16>
    %22 = arith.truncf %2 : vector<256x256xf32> to vector<256x256xbf16>
    %cst_11 = arith.constant dense<0.000000e+00> : vector<32x256xf32>
    %23 = tpu.matmul %21, %22, %cst_11 {dimension_numbers = #tpu.dot_dimension_numbers<[1], [0], [0], [1], [0, 0, 1, 1], [], []>} : vector<32x256xbf16>, vector<256x256xbf16>, vector<32x256xf32> -> vector<32x256xf32>
    %24 = arith.subf %17, %0 : vector<32x256xf32>
    %25 = arith.mulf %23, %24 : vector<32x256xf32>
    %26 = arith.addf %0, %25 : vector<32x256xf32>
    %c0_12 = arith.constant 0 : index
    %c0_13 = arith.constant 0 : index
    %27 = vector.load %arg4[%c0_12, %c0_13] : memref<32x256xf32, #tpu.memory_space<vmem>>, vector<32x256xf32>
    tpu.vector_store %arg4[%c0_12, %c0_13], %26 {strides = array<i32>} : memref<32x256xf32, #tpu.memory_space<vmem>>, vector<32x256xf32>,
    return
  }
  func.func @transform_0(%arg0: i32) -> (i32, i32) {
    %c0_i32 = arith.constant 0 : i32
    %c0_i32_0 = arith.constant 0 : i32
    return %c0_i32, %arg0 : i32, i32
  }
  func.func @transform_1(%arg0: i32) -> (i32, i32) {
    %c0_i32 = arith.constant 0 : i32
    %c0_i32_0 = arith.constant 0 : i32
    %c0_i32_1 = arith.constant 0 : i32
    return %c0_i32, %c0_i32_0 : i32, i32
  }
  func.func @transform_2(%arg0: i32) -> (i32, i32) {
    %c0_i32 = arith.constant 0 : i32
    %c0_i32_0 = arith.constant 0 : i32
    %c0_i32_1 = arith.constant 0 : i32
    return %c0_i32, %c0_i32_0 : i32, i32
  }
  func.func @transform_3(%arg0: i32) -> (i32, i32) {
    %c0_i32 = arith.constant 0 : i32
    %c0_i32_0 = arith.constant 0 : i32
    return %c0_i32, %arg0 : i32, i32
  }
}

</mosaic_0001>

<bundles_post_ra>
// kernel: tpu_custom_call.1
= control target key start
LH: loop header
LB: loop body
LE: loop exit
PB: predicated region body
PF: predicated region fallthrough
CT: control target
= control target key end

     0   :  { %8 = vsyncpa [#allocation3], 0  ;;  %s1158_s0 = inlined_call_operand.hbm [shape: f32[32,256], index: 0, kind: input, shape index: {}]   ;;  %s1159_s1 = inlined_call_operand.hbm [shape: f32[32,32], index: 1, kind: input, shape index: {}]   ;;  %s1160_s2 = inlined_call_operand.hbm [shape: f32[256,256], index: 2, kind: input, shape index: {}]   ;;  %s1161_s3 = inlined_call_operand.hbm [shape: f32[32,256], index: 3, kind: output, shape index: {}]  }
   0x1   :  { %9 = vsyncpa [#allocation6], 0  ;;  %s28_s14 = sshll.u32 %s1159_s1, 4  ;;  %s29_s14 = int_to_ptr.hbm [resolvable:$true] %s28_s14 }
   0x2   :  { %10 = vsyncpa [#allocation4], 0  ;;  %s767_s15 = smov [#allocation5]   ;;  %s15_s19 = sshll.u32 %s1158_s0, 4  ;;  %s16_s19 = int_to_ptr.hbm [resolvable:$true] %s15_s19 }
   0x3   :  { %s30_s16 = sshll.u32 %s767_s15, 4  ;;  %s768_s20 = smov 128   ;;  %s31_s16 = int_to_ptr.vmem [resolvable:$true] %s30_s16 }
   0x4   :  { %s769_s21 = smov 8   ;;  %s770_s22 = smov [#allocation2]  }
   0x5   :  { %36 = dma.hbm_to_vmem [thread:$0]  %s29_s14, 512, %s31_s16, [#allocation6], %s768_s20, %s768_s20, %s769_s21  }
   0x6   :  { %s17_s23 = sshll.u32 %s770_s22, 4  ;;  %s771_s24 = smov 256   ;;  %s18_s23 = int_to_ptr.vmem [resolvable:$true] %s17_s23 }
   0x7   :  { %s772_s25 = smov 16   ;;  %s41_s27 = sshll.u32 %s1160_s2, 4  ;;  %s42_s27 = int_to_ptr.hbm [resolvable:$true] %s41_s27 }
   0x8   :  { %23 = dma.hbm_to_vmem [thread:$0]  %s16_s19, 1024, %s18_s23, [#allocation3], %s771_s24, %s771_s24, %s772_s25  }
   0x9   :  { %s773_s28 = smov [#allocation7]  }
   0xa   :  { %s43_s0 = sshll.u32 %s773_s28, 4  ;;  %s44_s0 = int_to_ptr.vmem [resolvable:$true] %s43_s0 }
   0xb   :  { %49 = dma.hbm_to_vmem [thread:$0]  %s42_s27, 8192, %s44_s0, [#allocation6], %s771_s24, %s771_s24, %s772_s25  }
   0xc   :  { %761 = dma.done.wait [#allocation3], 1024  }
   0xd   :  { %762 = vsyncadd [#allocation3], 4294966272 }
   0xe   :  { %763 = dma.done.wait [#allocation6], 8704  }
   0xf   :  { %764 = vsyncadd [#allocation6], 4294958592  ;;  %v811_v0 = vld [vmem:[#allocation2 + $0x30] sm:$0xff]  ;;  %v813_v1 = vld [vmem:[#allocation2 + $0x38] sm:$0xff]  ;;  %vm139_vm0 = vcmask 261120   ;;  %s775_s2 = smov [#allocation8]  }
  0x10   :  { %1173 = vst [vmem:[#allocation12_spill] sm:$0xff] %v811_v0  ;;  %v815_v2 = vld [vmem:[#allocation2 + $0x20] sm:$0xff]  ;;  %164 = vmatpush.msra.mxu0 %v811_v0  ;;  %193 = vmatpush.msra.mxu1 %v813_v1  ;;  %v819_v3 = vld [vmem:[#allocation2 + $0x28] sm:$0xff]  ;;  %v821_v4 = vld [vmem:[#allocation2 + $0x10] sm:$0xff]  ;;  %s596_s29 = sshll.u32 %s775_s2, 4  ;;  %s598_s5 = sshll.u32 %s1161_s3, 4  ;;  %s597_s29 = int_to_ptr.vmem [resolvable:$true] %s596_s29  ;;  %s599_s5 = int_to_ptr.hbm [resolvable:$true] %s598_s5 }
  0x11   :  { %1174 = vst [vmem:[#allocation13_spill] sm:$0xff] %v813_v1  ;;  %v823_v5 = vld [vmem:[#allocation2 + $0x18] sm:$0xff]  ;;  %v825_v6 = vld [vmem:[#allocation2] sm:$0xff]  ;;  %v829_v7 = vld [vmem:[#allocation2 + $0x8] sm:$0xff] }
  0x12   :  { %1175 = vst [vmem:[#allocation14_spill] sm:$0xff] %v815_v2  ;;  %165 = vmatpush.msra.mxu0 %v815_v2  ;;  %194 = vmatpush.msra.mxu1 %v819_v3  ;;  %v71_v8 = vld [vmem:[#allocation5] sm:$0xff]  ;;  %v831_v9 = vld [vmem:[#allocation5 + $0x8] sm:$0xff]  ;;  %v836_v11 = vld [vmem:[#allocation7 + $0xf0] sm:$0xff] }
  0x13   :  { %1176 = vst [vmem:[#allocation15_spill] sm:$0xff] %v821_v4  ;;  %v834_v10 = vpack.c.bf16 %v831_v9, %v71_v8  ;;  %v838_v12 = vld [vmem:[#allocation7 + $0x1f0] sm:$0xff]  ;;  %v106_v13 = vld [vmem:[#allocation7 + $0xf8] sm:$0xff]  ;;  %v842_v15 = vld [vmem:[#allocation7 + $0xe0] sm:$0xff]  ;;  %210 = vmatpush.msra.mxu2 %v836_v11 }
  0x14   :  { %1177 = vst [vmem:[#allocation16_spill] sm:$0xff] %v825_v6  ;;  %166 = vmatpush.msra.mxu0 %v821_v4  ;;  %195 = vmatpush.msra.mxu1 %v823_v5  ;;  %v138_v14 = vld [vmem:[#allocation7 + $0x1f8] sm:$0xff]  ;;  %v844_v16 = vld [vmem:[#allocation7 + $0x1e0] sm:$0xff]  ;;  %v104_v19 = vld [vmem:[#allocation7 + $0xe8] sm:$0xff] }
  0x15   :  { %1178 = vst [vmem:[#allocation17_spill] sm:$0xff] %v834_v10  ;;  %239 = vmatpush.msra.mxu3 %v838_v12  ;;  %v136_v20 = vld [vmem:[#allocation7 + $0x1e8] sm:$0xff]  ;;  %v852_v21 = vld [vmem:[#allocation7 + $0xd0] sm:$0xff]  ;;  %v856_v22 = vpack.c.bf16 %v106_v13, %v104_v19  ;;  %v102_v25 = vld [vmem:[#allocation7 + $0xd8] sm:$0xff]  ;;  %211 = vmatpush.msra.mxu2 %v842_v15 }
  0x16   :  { %167 = vmatpush.msra.mxu0 %v825_v6  ;;  %196 = vmatpush.msra.mxu1 %v829_v7  ;;  %v858_v23 = vpack.c.bf16 %v138_v14, %v136_v20  ;;  %v860_v24 = vld [vmem:[#allocation7 + $0x1d0] sm:$0xff]  ;;  %v134_v26 = vld [vmem:[#allocation7 + $0x1d8] sm:$0xff]  ;;  %v864_v27 = vld [vmem:[#allocation7 + $0xc0] sm:$0xff] }
  0x17   :  { %612 = vmatmul.msk.f32.vlgmr.msra.gmra.mxu0 %vm139_vm0, %v71_v8  ;;  %616 = vmatmul.msk.f32.vlgmr.msra.gmra.mxu1 %vm139_vm0, %v71_v8  ;;  %v866_v28 = vld [vmem:[#allocation7 + $0x1c0] sm:$0xff]  ;;  %v100_v29 = vld [vmem:[#allocation7 + $0xc8] sm:$0xff]  ;;  %v874_v34 = vld [vmem:[#allocation7 + $0xb0] sm:$0xff] }
  0x18   :  { %268 = vmatpush.msrb.mxu0 %v106_v13  ;;  %297 = vmatpush.msrb.mxu1 %v138_v14  ;;  %v872_v32 = vpack.c.bf16 %v102_v25, %v100_v29  ;;  %v132_v33 = vld [vmem:[#allocation7 + $0x1c8] sm:$0xff]  ;;  %v876_v35 = vld [vmem:[#allocation7 + $0x1b0] sm:$0xff]  ;;  %v98_v37 = vld [vmem:[#allocation7 + $0xb8] sm:$0xff] }
  0x19   :  { %240 = vmatpush.msra.mxu3 %v844_v16  ;;  %v880_v36 = vpack.c.bf16 %v134_v26, %v132_v33  ;;  %v130_v38 = vld [vmem:[#allocation7 + $0x1b8] sm:$0xff]  ;;  %v882_v39 = vld [vmem:[#allocation7 + $0xa0] sm:$0xff]  ;;  %v96_v42 = vld [vmem:[#allocation7 + $0xa8] sm:$0xff]  ;;  %212 = vmatpush.msra.mxu2 %v852_v21 }
  0x1a   :  { %269 = vmatpush.msrb.mxu0 %v104_v19  ;;  %298 = vmatpush.msrb.mxu1 %v136_v20  ;;  %v886_v41 = vld [vmem:[#allocation7 + $0x1a0] sm:$0xff]  ;;  %v128_v43 = vld [vmem:[#allocation7 + $0x1a8] sm:$0xff]  ;;  %v892_v45 = vpack.c.bf16 %v98_v37, %v96_v42  ;;  %v896_v47 = vld [vmem:[#allocation7 + $0x90] sm:$0xff] }
  0x1b   :  { %241 = vmatpush.msra.mxu3 %v860_v24  ;;  %v894_v46 = vpack.c.bf16 %v130_v38, %v128_v43  ;;  %v898_v48 = vld [vmem:[#allocation7 + $0x190] sm:$0xff]  ;;  %v94_v49 = vld [vmem:[#allocation7 + $0x98] sm:$0xff]  ;;  %v900_v51 = vld [vmem:[#allocation7 + $0x80] sm:$0xff]  ;;  %213 = vmatpush.msra.mxu2 %v864_v27 }
  0x1c   :  { %270 = vmatpush.msrb.mxu0 %v102_v25  ;;  %299 = vmatpush.msrb.mxu1 %v134_v26  ;;  %v126_v50 = vld [vmem:[#allocation7 + $0x198] sm:$0xff]  ;;  %v902_v52 = vld [vmem:[#allocation7 + $0x180] sm:$0xff]  ;;  %v92_v55 = vld [vmem:[#allocation7 + $0x88] sm:$0xff] }
  0x1d   :  { %242 = vmatpush.msra.mxu3 %v866_v28  ;;  %v124_v56 = vld [vmem:[#allocation7 + $0x188] sm:$0xff]  ;;  %v910_v57 = vld [vmem:[#allocation7 + $0x70] sm:$0xff]  ;;  %v912_v58 = vpack.c.bf16 %v94_v49, %v92_v55  ;;  %v90_v61 = vld [vmem:[#allocation7 + $0x78] sm:$0xff]  ;;  %214 = vmatpush.msra.mxu2 %v874_v34 }
  0x1e   :  { %271 = vmatpush.msrb.mxu0 %v100_v29  ;;  %300 = vmatpush.msrb.mxu1 %v132_v33  ;;  %v914_v59 = vpack.c.bf16 %v126_v50, %v124_v56  ;;  %v916_v60 = vld [vmem:[#allocation7 + $0x170] sm:$0xff]  ;;  %v122_v62 = vld [vmem:[#allocation7 + $0x178] sm:$0xff]  ;;  %v922_v63 = vld [vmem:[#allocation7 + $0x60] sm:$0xff] }
  0x1f   :  { %613 = vmatmul.msk.f32.gmra.mxu0 %vm139_vm0, %v831_v9  ;;  %617 = vmatmul.msk.f32.gmra.mxu1 %vm139_vm0, %v831_v9  ;;  %v924_v8 = vld [vmem:[#allocation7 + $0x160] sm:$0xff]  ;;  %v88_v13 = vld [vmem:[#allocation7 + $0x68] sm:$0xff]  ;;  %v934_v26 = vld [vmem:[#allocation7 + $0x50] sm:$0xff] }
  0x20   :  { %243 = vmatpush.msra.mxu3 %v876_v35  ;;  %v932_v20 = vpack.c.bf16 %v90_v61, %v88_v13  ;;  %v120_v25 = vld [vmem:[#allocation7 + $0x168] sm:$0xff]  ;;  %v936_v9 = vld [vmem:[#allocation7 + $0x150] sm:$0xff]  ;;  %272 = vmatpush.msrb.mxu0 %v98_v37  ;;  %v86_v33 = vld [vmem:[#allocation7 + $0x58] sm:$0xff] }
  0x21   :  { %301 = vmatpush.msrb.mxu1 %v130_v38  ;;  %v938_v29 = vpack.c.bf16 %v122_v62, %v120_v25  ;;  %v118_v53 = vld [vmem:[#allocation7 + $0x158] sm:$0xff]  ;;  %v940_v54 = vld [vmem:[#allocation7 + $0x40] sm:$0xff]  ;;  %215 = vmatpush.msra.mxu2 %v882_v39  ;;  %v84_v40 = vld [vmem:[#allocation7 + $0x48] sm:$0xff] }
  0x22   :  { %244 = vmatpush.msra.mxu3 %v886_v41  ;;  %v946_v19 = vld [vmem:[#allocation7 + $0x140] sm:$0xff]  ;;  %v116_v44 = vld [vmem:[#allocation7 + $0x148] sm:$0xff]  ;;  %v948_v30 = vld [vmem:[#allocation5 + $0x10] sm:$0xff]  ;;  %273 = vmatpush.msrb.mxu0 %v96_v42  ;;  %v952_v38 = vpack.c.bf16 %v86_v33, %v84_v40 }
  0x23   :  { %302 = vmatpush.msrb.mxu1 %v128_v43  ;;  %v954_v31 = vpack.c.bf16 %v118_v53, %v116_v44  ;;  %v956_v17 = vld [vmem:[#allocation7 + $0x30] sm:$0xff]  ;;  %216 = vmatpush.msra.mxu2 %v896_v47  ;;  %v82_v14 = vld [vmem:[#allocation7 + $0x38] sm:$0xff]  ;;  %v962_v10 = vld [vmem:[#allocation7 + $0x20] sm:$0xff] }
  0x24   :  { %v958_v18 = vld [vmem:[#allocation7 + $0x130] sm:$0xff]  ;;  %245 = vmatpush.msra.mxu3 %v898_v48  ;;  %v964_v42 = vld [vmem:[#allocation7 + $0x120] sm:$0xff]  ;;  %274 = vmatpush.msrb.mxu0 %v94_v49  ;;  %v114_v43 = vld [vmem:[#allocation7 + $0x138] sm:$0xff]  ;;  %v454_v37 = vpack.c.bf16 %v956_v17, %v962_v10 }
  0x25   :  { %303 = vmatpush.msrb.mxu1 %v126_v50  ;;  %v470_v0 = vpack.c.bf16 %v958_v18, %v964_v42  ;;  %v80_v6 = vld [vmem:[#allocation7 + $0x28] sm:$0xff]  ;;  %217 = vmatpush.msra.mxu2 %v900_v51  ;;  %v984_v49 = vld [vmem:[#allocation5 + $0x18] sm:$0xff]  ;;  %v77_v50 = vld [vmem:[#allocation7 + $0x10] sm:$0xff] }
  0x26   :  { %v112_v4 = vld [vmem:[#allocation7 + $0x128] sm:$0xff]  ;;  %246 = vmatpush.msra.mxu3 %v902_v52  ;;  %v972_v2 = vpack.c.bf16 %v82_v14, %v80_v6  ;;  %275 = vmatpush.msrb.mxu0 %v92_v55  ;;  %v998_v55 = vld [vmem:[#allocation7 + $0x18] sm:$0xff] }
  0x27   :  { %v974_v1 = vpack.c.bf16 %v114_v43, %v112_v4  ;;  %614 = vmatmul.msk.f32.gmra.mxu0 %vm139_vm0, %v948_v30  ;;  %618 = vmatmul.msk.f32.gmra.mxu1 %vm139_vm0, %v948_v30 }
  0x28   :  { %304 = vmatpush.msrb.mxu1 %v124_v56  ;;  %218 = vmatpush.msra.mxu2 %v910_v57  ;;  %v1000_v56 = vld [vmem:[#allocation7 + $0x118] sm:$0xff] }
  0x29   :  { %247 = vmatpush.msra.mxu3 %v916_v60  ;;  %276 = vmatpush.msrb.mxu0 %v90_v61  ;;  %v76_v61 = vld [vmem:[#allocation7 + $0x8] sm:$0xff] }
  0x2a   :  { %305 = vmatpush.msrb.mxu1 %v122_v62  ;;  %219 = vmatpush.msra.mxu2 %v922_v63  ;;  %v108_v62 = vld [vmem:[#allocation7 + $0x108] sm:$0xff] }
  0x2b   :  { %248 = vmatpush.msra.mxu3 %v924_v8  ;;  %277 = vmatpush.msrb.mxu0 %v88_v13  ;;  %v1179_v13 = vpack.c.bf16 %v838_v12, %v844_v16  ;;  %v1184_v12 = vpack.c.bf16 %v874_v34, %v882_v39  ;;  %v1187_v16 = vpack.c.bf16 %v916_v60, %v924_v8 }
  0x2c   :  { %306 = vmatpush.msrb.mxu1 %v120_v25  ;;  %220 = vmatpush.msra.mxu2 %v934_v26  ;;  %v1183_v25 = vpack.c.bf16 %v876_v35, %v886_v41 }
  0x2d   :  { %249 = vmatpush.msra.mxu3 %v936_v9  ;;  %278 = vmatpush.msrb.mxu0 %v86_v33 }
  0x2e   :  { %307 = vmatpush.msrb.mxu1 %v118_v53  ;;  %221 = vmatpush.msra.mxu2 %v940_v54  ;;  %v109_v53 = vld [vmem:[#allocation7 + $0x110] sm:$0xff] }
  0x2f   :  { %615 = vmatmul.msk.f32.gmra.mxu0 %vm139_vm0, %v984_v49  ;;  %619 = vmatmul.msk.f32.gmra.mxu1 %vm139_vm0, %v984_v49 }
  0x30   :  { %250 = vmatpush.msra.mxu3 %v946_v19  ;;  %279 = vmatpush.msrb.mxu0 %v84_v40  ;;  %v75_v40 = vld [vmem:[#allocation7] sm:$0xff] }
  0x31   :  { %308 = vmatpush.msrb.mxu1 %v116_v44  ;;  %222 = vmatpush.msra.mxu2 %v956_v17  ;;  %v107_v44 = vld [vmem:[#allocation7 + $0x100] sm:$0xff] }
  0x32   :  { %251 = vmatpush.msra.mxu3 %v958_v18  ;;  %280 = vmatpush.msrb.mxu0 %v82_v14  ;;  %v1182_v14 = vpack.c.bf16 %v852_v21, %v864_v27  ;;  %v1188_v21 = vpack.c.bf16 %v910_v57, %v922_v63  ;;  %v1190_v27 = vpack.c.bf16 %v934_v26, %v940_v54 }
  0x33   :  { %309 = vmatpush.msrb.mxu1 %v114_v43  ;;  %223 = vmatpush.msra.mxu2 %v962_v10  ;;  %v468_v34 = vpack.c.bf16 %v109_v53, %v107_v44 }
  0x34   :  { %252 = vmatpush.msra.mxu3 %v964_v42  ;;  %281 = vmatpush.msrb.mxu0 %v80_v6  ;;  %v1181_v6 = vpack.c.bf16 %v860_v24, %v866_v28  ;;  %v1189_v24 = vpack.c.bf16 %v936_v9, %v946_v19  ;;  %v452_v28 = vpack.c.bf16 %v77_v50, %v75_v40 }
  0x35   :  { %310 = vmatpush.msrb.mxu1 %v112_v4  ;;  %224 = vmatpush.msra.mxu2 %v77_v50  ;;  %v1180_v4 = vpack.c.bf16 %v836_v11, %v842_v15  ;;  %v1185_v11 = vpack.c.bf16 %v898_v48, %v902_v52  ;;  %v1186_v15 = vpack.c.bf16 %v896_v47, %v900_v51 }
  0x36   :  { %253 = vmatpush.msra.mxu3 %v109_v53  ;;  %282 = vmatpush.msrb.mxu0 %v998_v55  ;;  %v1061_v48 = vpack.c.bf16 %v998_v55, %v76_v61  ;;  %v1064_v51 = vpack.c.bf16 %v1000_v56, %v108_v62 }
  0x37   :  { %311 = vmatpush.msrb.mxu1 %v1000_v56  ;;  %225 = vmatpush.msra.mxu2 %v75_v40 }
  0x38   :  { %254 = vmatpush.msra.mxu3 %v107_v44  ;;  %283 = vmatpush.msrb.mxu0 %v76_v61 }
  0x39   :  { %312 = vmatpush.msrb.mxu1 %v108_v62 }
  0x3a   :  { %484 = vmatpush.bf16.msra.mxu0 %v1180_v4 }
  0x3b   :  { %503 = vmatpush.bf16.msra.mxu1 %v1179_v13 }
  0x3e   :  { %485 = vmatpush.bf16.msra.mxu0 %v1182_v14 }
  0x3f   :  { %504 = vmatpush.bf16.msra.mxu1 %v1181_v6  ;;  %v1191_v6 = vld [vmem:[#allocation13_spill] sm:$0xff] }
  0x42   :  { %486 = vmatpush.bf16.msra.mxu0 %v1184_v12 }
  0x43   :  { %505 = vmatpush.bf16.msra.mxu1 %v1183_v25 }
  0x46   :  { %487 = vmatpush.bf16.msra.mxu0 %v1186_v15 }
  0x47   :  { %506 = vmatpush.bf16.msra.mxu1 %v1185_v11  ;;  %v1192_v11 = vld [vmem:[#allocation14_spill] sm:$0xff] }
  0x4a   :  { %488 = vmatpush.bf16.msra.mxu0 %v1188_v21 }
  0x4b   :  { %507 = vmatpush.bf16.msra.mxu1 %v1187_v16 }
  0x4e   :  { %489 = vmatpush.bf16.msra.mxu0 %v1190_v27 }
  0x4f   :  { %508 = vmatpush.bf16.msra.mxu1 %v1189_v24 }
  0x52   :  { %490 = vmatpush.bf16.msra.mxu0 %v454_v37 }
  0x53   :  { %509 = vmatpush.bf16.msra.mxu1 %v470_v0 }
  0x56   :  { %491 = vmatpush.bf16.msra.mxu0 %v452_v28  ;;  %v1193_v28 = vld [vmem:[#allocation15_spill] sm:$0xff] }
  0x57   :  { %510 = vmatpush.bf16.msra.mxu1 %v468_v34 }
  0x94   :  { %v169_v35 = vpop.f32.mrf.mxu0  ;;  %v198_v39 = vpop.f32.mrf.mxu1 }
  0x95   :  { %226 = vmatmul.f32.vlgmr.msra.gmra.mxu2 %v169_v35  ;;  %255 = vmatmul.f32.vlgmr.msra.gmra.mxu3 %v198_v39 }
  0x96   :  { %284 = vmatmul.f32.vlgmr.msrb.gmra.mxu0 %v169_v35  ;;  %313 = vmatmul.f32.vlgmr.msrb.gmra.mxu1 %v198_v39 }
  0x97   :  { %541 = vmatpush.bf16.msrb.mxu1 %v858_v23  ;;  %522 = vmatpush.bf16.msrb.mxu0 %v856_v22 }
  0x9b   :  { %542 = vmatpush.bf16.msrb.mxu1 %v880_v36  ;;  %523 = vmatpush.bf16.msrb.mxu0 %v872_v32 }
  0x9c   :  { %v172_v0 = vpop.f32.mrf.mxu0  ;;  %v201_v18 = vpop.f32.mrf.mxu1 }
  0x9d   :  { %229 = vmatmul.f32.gmra.mxu2 %v172_v0  ;;  %258 = vmatmul.f32.gmra.mxu3 %v201_v18 }
  0x9e   :  { %287 = vmatmul.f32.gmra.mxu0 %v172_v0  ;;  %316 = vmatmul.f32.gmra.mxu1 %v201_v18  ;;  %v1194_v0 = vld [vmem:[#allocation16_spill] sm:$0xff] }
  0x9f   :  { %543 = vmatpush.bf16.msrb.mxu1 %v894_v46  ;;  %524 = vmatpush.bf16.msrb.mxu0 %v892_v45 }
  0xa3   :  { %544 = vmatpush.bf16.msrb.mxu1 %v914_v59  ;;  %525 = vmatpush.bf16.msrb.mxu0 %v912_v58 }
  0xa4   :  { %v175_v10 = vpop.f32.mrf.mxu0  ;;  %v204_v17 = vpop.f32.mrf.mxu1 }
  0xa5   :  { %232 = vmatmul.f32.gmra.mxu2 %v175_v10  ;;  %261 = vmatmul.f32.gmra.mxu3 %v204_v17 }
  0xa6   :  { %290 = vmatmul.f32.gmra.mxu0 %v175_v10  ;;  %319 = vmatmul.f32.gmra.mxu1 %v204_v17  ;;  %v1195_v10 = vld [vmem:[#allocation12_spill] sm:$0xff] }
  0xa7   :  { %545 = vmatpush.bf16.msrb.mxu1 %v938_v29  ;;  %526 = vmatpush.bf16.msrb.mxu0 %v932_v20 }
  0xab   :  { %546 = vmatpush.bf16.msrb.mxu1 %v954_v31  ;;  %527 = vmatpush.bf16.msrb.mxu0 %v952_v38 }
  0xac   :  { %v178_v41 = vpop.f32.mrf.mxu0  ;;  %v207_v47 = vpop.f32.mrf.mxu1 }
  0xad   :  { %235 = vmatmul.f32.gmra.mxu2 %v178_v41  ;;  %264 = vmatmul.f32.gmra.mxu3 %v207_v47 }
  0xae   :  { %293 = vmatmul.f32.gmra.mxu0 %v178_v41  ;;  %322 = vmatmul.f32.gmra.mxu1 %v207_v47  ;;  %v774_v47 = vmov 1.0|1.0  }
  0xaf   :  { %547 = vmatpush.bf16.msrb.mxu1 %v974_v1  ;;  %528 = vmatpush.bf16.msrb.mxu0 %v972_v2 }
  0xb3   :  { %548 = vmatpush.bf16.msrb.mxu1 %v1064_v51  ;;  %529 = vmatpush.bf16.msrb.mxu0 %v1061_v48 }
 0x113   :  { %v285_v52 = vpop.f32.mrf.mxu0  ;;  %v314_v54 = vpop.f32.mrf.mxu1 }
 0x114   :  { %v315_v53 = vadd.f32 %v314_v54, %v285_v52 }
 0x116   :  { %v1075_v4 = vsub.f32 %v829_v7, %v315_v53 }
 0x118   :  { %v227_v57 = vpop.f32.mrf.mxu2  ;;  %v256_v60 = vpop.f32.mrf.mxu3  ;;  %v335_v39 = vand.u32 2147483647, %v1075_v4 }
 0x119   :  { %v257_v12 = vadd.f32 %v256_v60, %v227_v57  ;;  %v1196_v60 = vld [vmem:[#allocation17_spill] sm:$0xff] }
 0x11a   :  { %vm343_vm5 = vcmp.gt.f32.partialorder %v335_v39, 0.039215688  ;;  %v351_v39 = vmul.f32 0.5, %v1075_v4 }
 0x11b   :  { %v288_v63 = vpop.f32.mrf.mxu0  ;;  %v317_v8 = vpop.f32.mrf.mxu1  ;;  %v326_v18 = vsub.f32 %v1194_v0, %v257_v12 }
 0x11c   :  { %v318_v42 = vadd.f32 %v317_v8, %v288_v63 }
 0x11d   :  { %v334_v57 = vand.u32 2147483647, %v326_v18 }
 0x11e   :  { %v1072_v61 = vsub.f32 %v823_v5, %v318_v42 }
 0x11f   :  { %vm342_vm11 = vcmp.gt.f32.partialorder %v334_v57, 0.039215688 }
 0x120   :  { %v230_v19 = vpop.f32.mrf.mxu2  ;;  %v259_v26 = vpop.f32.mrf.mxu3  ;;  %v337_v27 = vand.u32 2147483647, %v1072_v61 }
 0x121   :  { %v260_v13 = vadd.f32 %v259_v26, %v230_v19 }
 0x122   :  { %vm345_vm4 = vcmp.gt.f32.partialorder %v337_v27, 0.039215688 }
 0x123   :  { %v291_v9 = vpop.f32.mrf.mxu0  ;;  %v320_v33 = vpop.f32.mrf.mxu1  ;;  %v1087_v34 = vsub.f32 %v1193_v28, %v260_v13  ;;  %vm636_vm6 = vmpackc.low %vm345_vm4, %vm343_vm5 }
 0x124   :  { %v321_v37 = vadd.f32 %v320_v33, %v291_v9 }
 0x125   :  { %v336_v54 = vand.u32 2147483647, %v1087_v34 }
 0x126   :  { %v1069_v55 = vsub.f32 %v819_v3, %v321_v37 }
 0x127   :  { %vm344_vm10 = vcmp.gt.f32.partialorder %v336_v54, 0.039215688 }
 0x128   :  { %v233_v43 = vpop.f32.mrf.mxu2  ;;  %v262_v50 = vpop.f32.mrf.mxu3  ;;  %v339_v25 = vand.u32 2147483647, %v1069_v55  ;;  %vm630_vm12 = vmpackc.low %vm344_vm10, %vm342_vm11 }
 0x129   :  { %v263_v56 = vadd.f32 %v262_v50, %v233_v43 }
 0x12a   :  { %vm347_vm1 = vcmp.gt.f32.partialorder %v339_v25, 0.039215688 }
 0x12b   :  { %v294_v40 = vpop.f32.mrf.mxu0  ;;  %v323_v44 = vpop.f32.mrf.mxu1  ;;  %v1082_v15 = vsub.f32 %v1192_v11, %v263_v56 }
 0x12c   :  { %v324_v62 = vadd.f32 %v323_v44, %v294_v40  ;;  %v355_v40 = vmul.f32 0.5, %v1069_v55 }
 0x12d   :  { %v338_v41 = vand.u32 2147483647, %v1082_v15  ;;  %v354_v26 = vmul.f32 0.5, %v1082_v15 }
 0x12e   :  { %v1078_v14 = vsub.f32 %v1191_v6, %v324_v62  ;;  %v363_v15 = vadd.f32 %v355_v40, %v819_v3 }
 0x12f   :  { %vm346_vm7 = vcmp.gt.f32.partialorder %v338_v41, 0.039215688  ;;  %v362_v50 = vadd.f32 %v354_v26, %v1192_v11 }
 0x130   :  { %v236_v16 = vpop.f32.mrf.mxu2  ;;  %v265_v21 = vpop.f32.mrf.mxu3  ;;  %v341_v24 = vand.u32 2147483647, %v1078_v14  ;;  %v371_v55 = vmax.f32 %v363_v15, 0.0 }
 0x131   :  { %v266_v35 = vadd.f32 %v265_v21, %v236_v16  ;;  %v370_v12 = vmax.f32 %v362_v50, 0.0 }
 0x132   :  { %vm349_vm2 = vcmp.gt.f32.partialorder %v341_v24, 0.039215688  ;;  %v379_v54 = vmin.f32 %v371_v55, 255.0 }
 0x133   :  { %v1092_v17 = vsub.f32 %v1195_v10, %v266_v35  ;;  %vm634_vm3 = vmpackc.low %vm349_vm2, %vm347_vm1  ;;  %v357_v35 = vmul.f32 0.5, %v1078_v14 }
 0x134   :  { %635 = vmatpush.bf16.msk.msrb.mxu3 %vm634_vm3, %v774_v47  ;;  %v565_v4 = vsub.f32 %v379_v54, %v819_v3 }
 0x135   :  { %v340_v52 = vand.u32 2147483647, %v1092_v17  ;;  %v356_v62 = vmul.f32 0.5, %v1092_v17 }
 0x137   :  { %vm348_vm8 = vcmp.gt.f32.partialorder %v340_v52, 0.039215688  ;;  %v364_v24 = vadd.f32 %v356_v62, %v1195_v10 }
 0x138   :  { %637 = vmatpush.bf16.msk.msrb.mxu3 %vm636_vm6, %v774_v47  ;;  %vm628_vm9 = vmpackc.low %vm348_vm8, %vm346_vm7 }
 0x139   :  { %629 = vmatpush.bf16.msk.msrb.mxu2 %vm628_vm9, %v774_v47  ;;  %v372_v41 = vmax.f32 %v364_v24, 0.0 }
 0x13b   :  { %638 = vmatmul.msk.bf16.vlgmr.msrb.gmra.mxu3 %vm139_vm0, %v1196_v60  ;;  %v380_v14 = vmin.f32 %v372_v41, 255.0 }
 0x13c   :  { %648 = vmatpush.bf16.msra.mxu3 %v858_v23  ;;  %v383_v23 = vpack.c.bf16 %v984_v49, %v948_v30  ;;  %v352_v49 = vmul.f32 0.5, %v1087_v34  ;;  %v378_v34 = vmin.f32 %v370_v12, 255.0 }
 0x13d   :  { %631 = vmatpush.bf16.msk.msrb.mxu2 %vm630_vm12, %v774_v47  ;;  %v365_v47 = vadd.f32 %v357_v35, %v1191_v6 }
 0x13e   :  { %v360_v63 = vadd.f32 %v352_v49, %v1193_v28  ;;  %v564_v17 = vsub.f32 %v378_v34, %v1192_v11 }
 0x140   :  { %649 = vmatpush.bf16.msra.mxu3 %v880_v36  ;;  %632 = vmatmul.msk.bf16.vlgmr.msrb.gmra.mxu2 %vm139_vm0, %v1196_v60  ;;  %v368_v37 = vmax.f32 %v360_v63, 0.0  ;;  %v359_v60 = vadd.f32 %v351_v39, %v829_v7 }
 0x141   :  { %640 = vmatpush.bf16.msra.mxu2 %v856_v22 }
 0x142   :  { %v376_v56 = vmin.f32 %v368_v37, 255.0 }
 0x144   :  { %650 = vmatpush.bf16.msra.mxu3 %v894_v46  ;;  %v562_v25 = vsub.f32 %v376_v56, %v1193_v28 }
 0x145   :  { %641 = vmatpush.bf16.msra.mxu2 %v872_v32 }
 0x148   :  { %651 = vmatpush.bf16.msra.mxu3 %v914_v59 }
 0x149   :  { %642 = vmatpush.bf16.msra.mxu2 %v892_v45 }
 0x14b   :  { %639 = vmatmul.msk.bf16.gmra.mxu3 %vm139_vm0, %v383_v23 }
 0x14c   :  { %652 = vmatpush.bf16.msra.mxu3 %v938_v29 }
 0x14d   :  { %643 = vmatpush.bf16.msra.mxu2 %v912_v58 }
 0x150   :  { %653 = vmatpush.bf16.msra.mxu3 %v954_v31  ;;  %633 = vmatmul.msk.bf16.gmra.mxu2 %vm139_vm0, %v383_v23 }
 0x151   :  { %644 = vmatpush.bf16.msra.mxu2 %v932_v20 }
 0x154   :  { %654 = vmatpush.bf16.msra.mxu3 %v974_v1 }
 0x155   :  { %645 = vmatpush.bf16.msra.mxu2 %v952_v38 }
 0x158   :  { %655 = vmatpush.bf16.msra.mxu3 %v1064_v51 }
 0x159   :  { %646 = vmatpush.bf16.msra.mxu2 %v972_v2  ;;  %v350_v2 = vmul.f32 0.5, %v326_v18 }
 0x15b   :  { %v358_v38 = vadd.f32 %v350_v2, %v1194_v0 }
 0x15d   :  { %647 = vmatpush.bf16.msra.mxu2 %v1061_v48  ;;  %v366_v48 = vmax.f32 %v358_v38, 0.0 }
 0x15f   :  { %v374_v8 = vmin.f32 %v366_v48, 255.0 }
 0x161   :  { %v560_v33 = vsub.f32 %v374_v8, %v1194_v0 }
 0x1be   :  { %v438_v22 = vpop.f32.mrf.mxu3 }
 0x1c3   :  { %v419_v30 = vpop.f32.mrf.mxu2 }
 0x1c6   :  { %v440_v32 = vpop.f32.mrf.mxu3 }
 0x1c7   :  { %v449_v36 = vpack.c.bf16 %v440_v32, %v438_v22  ;;  %v373_v32 = vmax.f32 %v365_v47, 0.0 }
 0x1c9   :  { %511 = vmatmul.bf16.vlgmr.msra.gmra.mxu1 %v449_v36 }
 0x1cb   :  { %v421_v31 = vpop.f32.mrf.mxu2 }
 0x1cc   :  { %v448_v45 = vpack.c.bf16 %v421_v31, %v419_v30  ;;  %v367_v31 = vmax.f32 %v359_v60, 0.0 }
 0x1ce   :  { %v443_v46 = vpop.f32.mrf.mxu3  ;;  %492 = vmatmul.bf16.vlgmr.msra.gmra.mxu0 %v448_v45  ;;  %v375_v49 = vmin.f32 %v367_v31, 255.0 }
 0x1d3   :  { %v424_v58 = vpop.f32.mrf.mxu2 }
 0x1d6   :  { %v445_v59 = vpop.f32.mrf.mxu3 }
 0x1d7   :  { %v451_v1 = vpack.c.bf16 %v445_v59, %v443_v46  ;;  %v566_v59 = vsub.f32 %v380_v14, %v1195_v10 }
 0x1d9   :  { %516 = vmatmul.bf16.gmra.mxu1 %v451_v1  ;;  %554 = vmatmul.bf16.vlgmr.msra.gmra.mxu3 %v451_v1 }
 0x1db   :  { %v426_v20 = vpop.f32.mrf.mxu2 }
 0x1dc   :  { %v450_v29 = vpack.c.bf16 %v426_v20, %v424_v58 }
 0x1de   :  { %497 = vmatmul.bf16.gmra.mxu0 %v450_v29  ;;  %535 = vmatmul.bf16.vlgmr.msra.gmra.mxu2 %v450_v29  ;;  %v381_v29 = vmin.f32 %v373_v32, 255.0 }
 0x1e9   :  { %549 = vmatmul.bf16.vlgmr.msrb.gmra.mxu1 %v449_v36 }
 0x1ee   :  { %530 = vmatmul.bf16.vlgmr.msrb.gmra.mxu0 %v448_v45  ;;  %v353_v45 = vmul.f32 0.5, %v1072_v61  ;;  %v567_v61 = vsub.f32 %v381_v29, %v1191_v6 }
 0x246   :  { %v512_v51 = vpop.f32.mrf.mxu1 }
 0x24b   :  { %v493_v19 = vpop.f32.mrf.mxu0 }
 0x24c   :  { %v513_v9 = vadd.f32 %v512_v51, %v493_v19 }
 0x24e   :  { %v568_v42 = vmul.f32 %v560_v33, %v513_v9  ;;  %v514_v43 = vpop.f32.mrf.mxu1 }
 0x250   :  { %v576_v53 = vadd.f32 %v568_v42, %v1194_v0 }
 0x252   :  { %584 = vst [vmem:[#allocation8] sm:$0xff] %v576_v53 }
 0x253   :  { %v495_v44 = vpop.f32.mrf.mxu0 }
 0x254   :  { %v515_v13 = vadd.f32 %v514_v43, %v495_v44 }
 0x256   :  { %v570_v16 = vmul.f32 %v562_v25, %v515_v13  ;;  %v517_v21 = vpop.f32.mrf.mxu1 }
 0x258   :  { %v578_v27 = vadd.f32 %v570_v16, %v1193_v28 }
 0x25a   :  { %586 = vst [vmem:[#allocation8 + $0x10] sm:$0xff] %v578_v27 }
 0x25b   :  { %v498_v0 = vpop.f32.mrf.mxu0 }
 0x25c   :  { %v518_v18 = vadd.f32 %v517_v21, %v498_v0  ;;  %v555_v57 = vpop.f32.mrf.mxu3 }
 0x25e   :  { %v572_v52 = vmul.f32 %v564_v17, %v518_v18  ;;  %v519_v28 = vpop.f32.mrf.mxu1 }
 0x260   :  { %v580_v23 = vadd.f32 %v572_v52, %v1192_v11  ;;  %v361_v11 = vadd.f32 %v353_v45, %v823_v5 }
 0x261   :  { %v536_v22 = vpop.f32.mrf.mxu2 }
 0x262   :  { %588 = vst [vmem:[#allocation8 + $0x20] sm:$0xff] %v580_v23  ;;  %v556_v30 = vadd.f32 %v555_v57, %v536_v22  ;;  %v369_v9 = vmax.f32 %v361_v11, 0.0 }
 0x263   :  { %v500_v36 = vpop.f32.mrf.mxu0 }
 0x264   :  { %v573_v46 = vmul.f32 %v565_v4, %v556_v30  ;;  %v520_v58 = vadd.f32 %v519_v28, %v500_v36  ;;  %v557_v38 = vpop.f32.mrf.mxu3  ;;  %v377_v42 = vmin.f32 %v369_v9, 255.0 }
 0x266   :  { %v581_v1 = vadd.f32 %v573_v46, %v819_v3  ;;  %v574_v20 = vmul.f32 %v566_v59, %v520_v58  ;;  %v550_v48 = vpop.f32.mrf.mxu1  ;;  %v561_v3 = vsub.f32 %v375_v49, %v829_v7  ;;  %v563_v56 = vsub.f32 %v377_v42, %v823_v5 }
 0x268   :  { %589 = vst [vmem:[#allocation8 + $0x28] sm:$0xff] %v581_v1  ;;  %v582_v2 = vadd.f32 %v574_v20, %v1195_v10 }
 0x269   :  { %v538_v51 = vpop.f32.mrf.mxu2 }
 0x26a   :  { %590 = vst [vmem:[#allocation8 + $0x30] sm:$0xff] %v582_v2  ;;  %v558_v63 = vadd.f32 %v557_v38, %v538_v51 }
 0x26b   :  { %v531_v8 = vpop.f32.mrf.mxu0 }
 0x26c   :  { %v575_v19 = vmul.f32 %v567_v61, %v558_v63  ;;  %v551_v26 = vadd.f32 %v550_v48, %v531_v8 }
 0x26e   :  { %v583_v33 = vadd.f32 %v575_v19, %v1191_v6  ;;  %v569_v37 = vmul.f32 %v561_v3, %v551_v26  ;;  %v552_v43 = vpop.f32.mrf.mxu1 }
 0x270   :  { %591 = vst [vmem:[#allocation8 + $0x38] sm:$0xff] %v583_v33  ;;  %v577_v10 = vadd.f32 %v569_v37, %v829_v7 }
 0x272   :  { %585 = vst [vmem:[#allocation8 + $0x8] sm:$0xff] %v577_v10 }
 0x273   :  { %v533_v50 = vpop.f32.mrf.mxu0 }
 0x274   :  { %v553_v53 = vadd.f32 %v552_v43, %v533_v50 }
 0x276   :  { %v571_v40 = vmul.f32 %v563_v56, %v553_v53 }
 0x278   :  { %v579_v6 = vadd.f32 %v571_v40, %v823_v5 }
 0x27a   :  { %587 = vst [vmem:[#allocation8 + $0x18] sm:$0xff] %v579_v6 }
 0x27b   :  { %604 = dma.vmem_to_hbm [thread:$0]  %s597_s29, 1024, %s599_s5, [#allocation4], %s771_s24, %s771_s24, %s772_s25  }
 0x27c   :  { %765 = dma.done.wait [#allocation4], 1024  }
 0x27d   :  { %766 = vsyncadd [#allocation4], 4294966272 }
 0x27e   :  { %609 = vsyncpa [#allocation3], 1 }
 0x27f   :  { %610 = vsyncpa [#allocation6], 1 }
 0x280   :  { %611 = vsyncpa [#allocation4], 1 }

// kernel: tpu_custom_call.1
= control target key start
LH: loop header
LB: loop body
LE: loop exit
PB: predicated region body
PF: predicated region fallthrough
CT: control target
= control target key end

     0   :  { %8 = vsyncpa [#allocation3], 0  ;;  %s1158_s0 = inlined_call_operand.hbm [shape: f32[32,256], index: 0, kind: input, shape index: {}]   ;;  %s1159_s1 = inlined_call_operand.hbm [shape: f32[32,32], index: 1, kind: input, shape index: {}]   ;;  %s1160_s2 = inlined_call_operand.hbm [shape: f32[256,256], index: 2, kind: input, shape index: {}]   ;;  %s1161_s3 = inlined_call_operand.hbm [shape: f32[32,256], index: 3, kind: output, shape index: {}]  }
   0x1   :  { %9 = vsyncpa [#allocation6], 0  ;;  %s28_s14 = sshll.u32 %s1159_s1, 4  ;;  %s29_s14 = int_to_ptr.hbm [resolvable:$true] %s28_s14 }
   0x2   :  { %10 = vsyncpa [#allocation4], 0  ;;  %s767_s15 = smov [#allocation5]   ;;  %s15_s19 = sshll.u32 %s1158_s0, 4  ;;  %s16_s19 = int_to_ptr.hbm [resolvable:$true] %s15_s19 }
   0x3   :  { %s30_s16 = sshll.u32 %s767_s15, 4  ;;  %s768_s20 = smov 128   ;;  %s31_s16 = int_to_ptr.vmem [resolvable:$true] %s30_s16 }
   0x4   :  { %s769_s21 = smov 8   ;;  %s770_s22 = smov [#allocation2]  }
   0x5   :  { %36 = dma.hbm_to_vmem [thread:$0]  %s29_s14, 512, %s31_s16, [#allocation6], %s768_s20, %s768_s20, %s769_s21  }
   0x6   :  { %s17_s23 = sshll.u32 %s770_s22, 4  ;;  %s771_s24 = smov 256   ;;  %s18_s23 = int_to_ptr.vmem [resolvable:$true] %s17_s23 }
   0x7   :  { %s772_s25 = smov 16   ;;  %s41_s27 = sshll.u32 %s1160_s2, 4  ;;  %s42_s27 = int_to_ptr.hbm [resolvable:$true] %s41_s27 }
   0x8   :  { %23 = dma.hbm_to_vmem [thread:$0]  %s16_s19, 1024, %s18_s23, [#allocation3], %s771_s24, %s771_s24, %s772_s25  }
   0x9   :  { %s773_s28 = smov [#allocation7]  }
   0xa   :  { %s43_s0 = sshll.u32 %s773_s28, 4  ;;  %s44_s0 = int_to_ptr.vmem [resolvable:$true] %s43_s0 }
   0xb   :  { %49 = dma.hbm_to_vmem [thread:$0]  %s42_s27, 8192, %s44_s0, [#allocation6], %s771_s24, %s771_s24, %s772_s25  }
   0xc   :  { %761 = dma.done.wait [#allocation3], 1024  }
   0xd   :  { %762 = vsyncadd [#allocation3], 4294966272 }
   0xe   :  { %763 = dma.done.wait [#allocation6], 8704  }
   0xf   :  { %764 = vsyncadd [#allocation6], 4294958592  ;;  %v811_v0 = vld [vmem:[#allocation2 + $0x30] sm:$0xff]  ;;  %v813_v1 = vld [vmem:[#allocation2 + $0x38] sm:$0xff]  ;;  %vm139_vm0 = vcmask 261120   ;;  %s775_s2 = smov [#allocation8]  }
  0x10   :  { %1173 = vst [vmem:[#allocation12_spill] sm:$0xff] %v811_v0  ;;  %v815_v2 = vld [vmem:[#allocation2 + $0x20] sm:$0xff]  ;;  %164 = vmatpush.msra.mxu0 %v811_v0  ;;  %193 = vmatpush.msra.mxu1 %v813_v1  ;;  %v819_v3 = vld [vmem:[#allocation2 + $0x28] sm:$0xff]  ;;  %v821_v4 = vld [vmem:[#allocation2 + $0x10] sm:$0xff]  ;;  %s596_s29 = sshll.u32 %s775_s2, 4  ;;  %s598_s5 = sshll.u32 %s1161_s3, 4  ;;  %s597_s29 = int_to_ptr.vmem [resolvable:$true] %s596_s29  ;;  %s599_s5 = int_to_ptr.hbm [resolvable:$true] %s598_s5 }
  0x11   :  { %1174 = vst [vmem:[#allocation13_spill] sm:$0xff] %v813_v1  ;;  %v823_v5 = vld [vmem:[#allocation2 + $0x18] sm:$0xff]  ;;  %v825_v6 = vld [vmem:[#allocation2] sm:$0xff]  ;;  %v829_v7 = vld [vmem:[#allocation2 + $0x8] sm:$0xff] }
  0x12   :  { %1175 = vst [vmem:[#allocation14_spill] sm:$0xff] %v815_v2  ;;  %165 = vmatpush.msra.mxu0 %v815_v2  ;;  %194 = vmatpush.msra.mxu1 %v819_v3  ;;  %v71_v8 = vld [vmem:[#allocation5] sm:$0xff]  ;;  %v831_v9 = vld [vmem:[#allocation5 + $0x8] sm:$0xff]  ;;  %v836_v11 = vld [vmem:[#allocation7 + $0xf0] sm:$0xff] }
  0x13   :  { %1176 = vst [vmem:[#allocation15_spill] sm:$0xff] %v821_v4  ;;  %v834_v10 = vpack.c.bf16 %v831_v9, %v71_v8  ;;  %v838_v12 = vld [vmem:[#allocation7 + $0x1f0] sm:$0xff]  ;;  %v106_v13 = vld [vmem:[#allocation7 + $0xf8] sm:$0xff]  ;;  %v842_v15 = vld [vmem:[#allocation7 + $0xe0] sm:$0xff]  ;;  %210 = vmatpush.msra.mxu2 %v836_v11 }
  0x14   :  { %1177 = vst [vmem:[#allocation16_spill] sm:$0xff] %v825_v6  ;;  %166 = vmatpush.msra.mxu0 %v821_v4  ;;  %195 = vmatpush.msra.mxu1 %v823_v5  ;;  %v138_v14 = vld [vmem:[#allocation7 + $0x1f8] sm:$0xff]  ;;  %v844_v16 = vld [vmem:[#allocation7 + $0x1e0] sm:$0xff]  ;;  %v104_v19 = vld [vmem:[#allocation7 + $0xe8] sm:$0xff] }
  0x15   :  { %1178 = vst [vmem:[#allocation17_spill] sm:$0xff] %v834_v10  ;;  %239 = vmatpush.msra.mxu3 %v838_v12  ;;  %v136_v20 = vld [vmem:[#allocation7 + $0x1e8] sm:$0xff]  ;;  %v852_v21 = vld [vmem:[#allocation7 + $0xd0] sm:$0xff]  ;;  %v856_v22 = vpack.c.bf16 %v106_v13, %v104_v19  ;;  %v102_v25 = vld [vmem:[#allocation7 + $0xd8] sm:$0xff]  ;;  %211 = vmatpush.msra.mxu2 %v842_v15 }
  0x16   :  { %167 = vmatpush.msra.mxu0 %v825_v6  ;;  %196 = vmatpush.msra.mxu1 %v829_v7  ;;  %v858_v23 = vpack.c.bf16 %v138_v14, %v136_v20  ;;  %v860_v24 = vld [vmem:[#allocation7 + $0x1d0] sm:$0xff]  ;;  %v134_v26 = vld [vmem:[#allocation7 + $0x1d8] sm:$0xff]  ;;  %v864_v27 = vld [vmem:[#allocation7 + $0xc0] sm:$0xff] }
  0x17   :  { %612 = vmatmul.msk.f32.vlgmr.msra.gmra.mxu0 %vm139_vm0, %v71_v8  ;;  %616 = vmatmul.msk.f32.vlgmr.msra.gmra.mxu1 %vm139_vm0, %v71_v8  ;;  %v866_v28 = vld [vmem:[#allocation7 + $0x1c0] sm:$0xff]  ;;  %v100_v29 = vld [vmem:[#allocation7 + $0xc8] sm:$0xff]  ;;  %v874_v34 = vld [vmem:[#allocation7 + $0xb0] sm:$0xff] }
  0x18   :  { %268 = vmatpush.msrb.mxu0 %v106_v13  ;;  %297 = vmatpush.msrb.mxu1 %v138_v14  ;;  %v872_v32 = vpack.c.bf16 %v102_v25, %v100_v29  ;;  %v132_v33 = vld [vmem:[#allocation7 + $0x1c8] sm:$0xff]  ;;  %v876_v35 = vld [vmem:[#allocation7 + $0x1b0] sm:$0xff]  ;;  %v98_v37 = vld [vmem:[#allocation7 + $0xb8] sm:$0xff] }
  0x19   :  { %240 = vmatpush.msra.mxu3 %v844_v16  ;;  %v880_v36 = vpack.c.bf16 %v134_v26, %v132_v33  ;;  %v130_v38 = vld [vmem:[#allocation7 + $0x1b8] sm:$0xff]  ;;  %v882_v39 = vld [vmem:[#allocation7 + $0xa0] sm:$0xff]  ;;  %v96_v42 = vld [vmem:[#allocation7 + $0xa8] sm:$0xff]  ;;  %212 = vmatpush.msra.mxu2 %v852_v21 }
  0x1a   :  { %269 = vmatpush.msrb.mxu0 %v104_v19  ;;  %298 = vmatpush.msrb.mxu1 %v136_v20  ;;  %v886_v41 = vld [vmem:[#allocation7 + $0x1a0] sm:$0xff]  ;;  %v128_v43 = vld [vmem:[#allocation7 + $0x1a8] sm:$0xff]  ;;  %v892_v45 = vpack.c.bf16 %v98_v37, %v96_v42  ;;  %v896_v47 = vld [vmem:[#allocation7 + $0x90] sm:$0xff] }
  0x1b   :  { %241 = vmatpush.msra.mxu3 %v860_v24  ;;  %v894_v46 = vpack.c.bf16 %v130_v38, %v128_v43  ;;  %v898_v48 = vld [vmem:[#allocation7 + $0x190] sm:$0xff]  ;;  %v94_v49 = vld [vmem:[#allocation7 + $0x98] sm:$0xff]  ;;  %v900_v51 = vld [vmem:[#allocation7 + $0x80] sm:$0xff]  ;;  %213 = vmatpush.msra.mxu2 %v864_v27 }
  0x1c   :  { %270 = vmatpush.msrb.mxu0 %v102_v25  ;;  %299 = vmatpush.msrb.mxu1 %v134_v26  ;;  %v126_v50 = vld [vmem:[#allocation7 + $0x198] sm:$0xff]  ;;  %v902_v52 = vld [vmem:[#allocation7 + $0x180] sm:$0xff]  ;;  %v92_v55 = vld [vmem:[#allocation7 + $0x88] sm:$0xff] }
  0x1d   :  { %242 = vmatpush.msra.mxu3 %v866_v28  ;;  %v124_v56 = vld [vmem:[#allocation7 + $0x188] sm:$0xff]  ;;  %v910_v57 = vld [vmem:[#allocation7 + $0x70] sm:$0xff]  ;;  %v912_v58 = vpack.c.bf16 %v94_v49, %v92_v55  ;;  %v90_v61 = vld [vmem:[#allocation7 + $0x78] sm:$0xff]  ;;  %214 = vmatpush.msra.mxu2 %v874_v34 }
  0x1e   :  { %271 = vmatpush.msrb.mxu0 %v100_v29  ;;  %300 = vmatpush.msrb.mxu1 %v132_v33  ;;  %v914_v59 = vpack.c.bf16 %v126_v50, %v124_v56  ;;  %v916_v60 = vld [vmem:[#allocation7 + $0x170] sm:$0xff]  ;;  %v122_v62 = vld [vmem:[#allocation7 + $0x178] sm:$0xff]  ;;  %v922_v63 = vld [vmem:[#allocation7 + $0x60] sm:$0xff] }
  0x1f   :  { %613 = vmatmul.msk.f32.gmra.mxu0 %vm139_vm0, %v831_v9  ;;  %617 = vmatmul.msk.f32.gmra.mxu1 %vm139_vm0, %v831_v9  ;;  %v924_v8 = vld [vmem:[#allocation7 + $0x160] sm:$0xff]  ;;  %v88_v13 = vld [vmem:[#allocation7 + $0x68] sm:$0xff]  ;;  %v934_v26 = vld [vmem:[#allocation7 + $0x50] sm:$0xff] }
  0x20   :  { %243 = vmatpush.msra.mxu3 %v876_v35  ;;  %v932_v20 = vpack.c.bf16 %v90_v61, %v88_v13  ;;  %v120_v25 = vld [vmem:[#allocation7 + $0x168] sm:$0xff]  ;;  %v936_v9 = vld [vmem:[#allocation7 + $0x150] sm:$0xff]  ;;  %272 = vmatpush.msrb.mxu0 %v98_v37  ;;  %v86_v33 = vld [vmem:[#allocation7 + $0x58] sm:$0xff] }
  0x21   :  { %301 = vmatpush.msrb.mxu1 %v130_v38  ;;  %v938_v29 = vpack.c.bf16 %v122_v62, %v120_v25  ;;  %v118_v53 = vld [vmem:[#allocation7 + $0x158] sm:$0xff]  ;;  %v940_v54 = vld [vmem:[#allocation7 + $0x40] sm:$0xff]  ;;  %215 = vmatpush.msra.mxu2 %v882_v39  ;;  %v84_v40 = vld [vmem:[#allocation7 + $0x48] sm:$0xff] }
  0x22   :  { %244 = vmatpush.msra.mxu3 %v886_v41  ;;  %v946_v19 = vld [vmem:[#allocation7 + $0x140] sm:$0xff]  ;;  %v116_v44 = vld [vmem:[#allocation7 + $0x148] sm:$0xff]  ;;  %v948_v30 = vld [vmem:[#allocation5 + $0x10] sm:$0xff]  ;;  %273 = vmatpush.msrb.mxu0 %v96_v42  ;;  %v952_v38 = vpack.c.bf16 %v86_v33, %v84_v40 }
  0x23   :  { %302 = vmatpush.msrb.mxu1 %v128_v43  ;;  %v954_v31 = vpack.c.bf16 %v118_v53, %v116_v44  ;;  %v956_v17 = vld [vmem:[#allocation7 + $0x30] sm:$0xff]  ;;  %216 = vmatpush.msra.mxu2 %v896_v47  ;;  %v82_v14 = vld [vmem:[#allocation7 + $0x38] sm:$0xff]  ;;  %v962_v10 = vld [vmem:[#allocation7 + $0x20] sm:$0xff] }
  0x24   :  { %v958_v18 = vld [vmem:[#allocation7 + $0x130] sm:$0xff]  ;;  %245 = vmatpush.msra.mxu3 %v898_v48  ;;  %v964_v42 = vld [vmem:[#allocation7 + $0x120] sm:$0xff]  ;;  %274 = vmatpush.msrb.mxu0 %v94_v49  ;;  %v114_v43 = vld [vmem:[#allocation7 + $0x138] sm:$0xff]  ;;  %v454_v37 = vpack.c.bf16 %v956_v17, %v962_v10 }
  0x25   :  { %303 = vmatpush.msrb.mxu1 %v126_v50  ;;  %v470_v0 = vpack.c.bf16 %v958_v18, %v964_v42  ;;  %v80_v6 = vld [vmem:[#allocation7 + $0x28] sm:$0xff]  ;;  %217 = vmatpush.msra.mxu2 %v900_v51  ;;  %v984_v49 = vld [vmem:[#allocation5 + $0x18] sm:$0xff]  ;;  %v77_v50 = vld [vmem:[#allocation7 + $0x10] sm:$0xff] }
  0x26   :  { %v112_v4 = vld [vmem:[#allocation7 + $0x128] sm:$0xff]  ;;  %246 = vmatpush.msra.mxu3 %v902_v52  ;;  %v972_v2 = vpack.c.bf16 %v82_v14, %v80_v6  ;;  %275 = vmatpush.msrb.mxu0 %v92_v55  ;;  %v998_v55 = vld [vmem:[#allocation7 + $0x18] sm:$0xff] }
  0x27   :  { %v974_v1 = vpack.c.bf16 %v114_v43, %v112_v4  ;;  %614 = vmatmul.msk.f32.gmra.mxu0 %vm139_vm0, %v948_v30  ;;  %618 = vmatmul.msk.f32.gmra.mxu1 %vm139_vm0, %v948_v30 }
  0x28   :  { %304 = vmatpush.msrb.mxu1 %v124_v56  ;;  %218 = vmatpush.msra.mxu2 %v910_v57  ;;  %v1000_v56 = vld [vmem:[#allocation7 + $0x118] sm:$0xff] }
  0x29   :  { %247 = vmatpush.msra.mxu3 %v916_v60  ;;  %276 = vmatpush.msrb.mxu0 %v90_v61  ;;  %v76_v61 = vld [vmem:[#allocation7 + $0x8] sm:$0xff] }
  0x2a   :  { %305 = vmatpush.msrb.mxu1 %v122_v62  ;;  %219 = vmatpush.msra.mxu2 %v922_v63  ;;  %v108_v62 = vld [vmem:[#allocation7 + $0x108] sm:$0xff] }
  0x2b   :  { %248 = vmatpush.msra.mxu3 %v924_v8  ;;  %277 = vmatpush.msrb.mxu0 %v88_v13  ;;  %v1179_v13 = vpack.c.bf16 %v838_v12, %v844_v16  ;;  %v1184_v12 = vpack.c.bf16 %v874_v34, %v882_v39  ;;  %v1187_v16 = vpack.c.bf16 %v916_v60, %v924_v8 }
  0x2c   :  { %306 = vmatpush.msrb.mxu1 %v120_v25  ;;  %220 = vmatpush.msra.mxu2 %v934_v26  ;;  %v1183_v25 = vpack.c.bf16 %v876_v35, %v886_v41 }
  0x2d   :  { %249 = vmatpush.msra.mxu3 %v936_v9  ;;  %278 = vmatpush.msrb.mxu0 %v86_v33 }
  0x2e   :  { %307 = vmatpush.msrb.mxu1 %v118_v53  ;;  %221 = vmatpush.msra.mxu2 %v940_v54  ;;  %v109_v53 = vld [vmem:[#allocation7 + $0x110] sm:$0xff] }
  0x2f   :  { %615 = vmatmul.msk.f32.gmra.mxu0 %vm139_vm0, %v984_v49  ;;  %619 = vmatmul.msk.f32.gmra.mxu1 %vm139_vm0, %v984_v49 }
  0x30   :  { %250 = vmatpush.msra.mxu3 %v946_v19  ;;  %279 = vmatpush.msrb.mxu0 %v84_v40  ;;  %v75_v40 = vld [vmem:[#allocation7] sm:$0xff] }
  0x31   :  { %308 = vmatpush.msrb.mxu1 %v116_v44  ;;  %222 = vmatpush.msra.mxu2 %v956_v17  ;;  %v107_v44 = vld [vmem:[#allocation7 + $0x100] sm:$0xff] }
  0x32   :  { %251 = vmatpush.msra.mxu3 %v958_v18  ;;  %280 = vmatpush.msrb.mxu0 %v82_v14  ;;  %v1182_v14 = vpack.c.bf16 %v852_v21, %v864_v27  ;;  %v1188_v21 = vpack.c.bf16 %v910_v57, %v922_v63  ;;  %v1190_v27 = vpack.c.bf16 %v934_v26, %v940_v54 }
  0x33   :  { %309 = vmatpush.msrb.mxu1 %v114_v43  ;;  %223 = vmatpush.msra.mxu2 %v962_v10  ;;  %v468_v34 = vpack.c.bf16 %v109_v53, %v107_v44 }
  0x34   :  { %252 = vmatpush.msra.mxu3 %v964_v42  ;;  %281 = vmatpush.msrb.mxu0 %v80_v6  ;;  %v1181_v6 = vpack.c.bf16 %v860_v24, %v866_v28  ;;  %v1189_v24 = vpack.c.bf16 %v936_v9, %v946_v19  ;;  %v452_v28 = vpack.c.bf16 %v77_v50, %v75_v40 }
  0x35   :  { %310 = vmatpush.msrb.mxu1 %v112_v4  ;;  %224 = vmatpush.msra.mxu2 %v77_v50  ;;  %v1180_v4 = vpack.c.bf16 %v836_v11, %v842_v15  ;;  %v1185_v11 = vpack.c.bf16 %v898_v48, %v902_v52  ;;  %v1186_v15 = vpack.c.bf16 %v896_v47, %v900_v51 }
  0x36   :  { %253 = vmatpush.msra.mxu3 %v109_v53  ;;  %282 = vmatpush.msrb.mxu0 %v998_v55  ;;  %v1061_v48 = vpack.c.bf16 %v998_v55, %v76_v61  ;;  %v1064_v51 = vpack.c.bf16 %v1000_v56, %v108_v62 }
  0x37   :  { %311 = vmatpush.msrb.mxu1 %v1000_v56  ;;  %225 = vmatpush.msra.mxu2 %v75_v40 }
  0x38   :  { %254 = vmatpush.msra.mxu3 %v107_v44  ;;  %283 = vmatpush.msrb.mxu0 %v76_v61 }
  0x39   :  { %312 = vmatpush.msrb.mxu1 %v108_v62 }
  0x3a   :  { %484 = vmatpush.bf16.msra.mxu0 %v1180_v4 }
  0x3b   :  { %503 = vmatpush.bf16.msra.mxu1 %v1179_v13 }
  0x3e   :  { %485 = vmatpush.bf16.msra.mxu0 %v1182_v14 }
  0x3f   :  { %504 = vmatpush.bf16.msra.mxu1 %v1181_v6  ;;  %v1191_v6 = vld [vmem:[#allocation13_spill] sm:$0xff] }
  0x42   :  { %486 = vmatpush.bf16.msra.mxu0 %v1184_v12 }
  0x43   :  { %505 = vmatpush.bf16.msra.mxu1 %v1183_v25 }
  0x46   :  { %487 = vmatpush.bf16.msra.mxu0 %v1186_v15 }
  0x47   :  { %506 = vmatpush.bf16.msra.mxu1 %v1185_v11  ;;  %v1192_v11 = vld [vmem:[#allocation14_spill] sm:$0xff] }
  0x4a   :  { %488 = vmatpush.bf16.msra.mxu0 %v1188_v21 }
  0x4b   :  { %507 = vmatpush.bf16.msra.mxu1 %v1187_v16 }
  0x4e   :  { %489 = vmatpush.bf16.msra.mxu0 %v1190_v27 }
  0x4f   :  { %508 = vmatpush.bf16.msra.mxu1 %v1189_v24 }
  0x52   :  { %490 = vmatpush.bf16.msra.mxu0 %v454_v37 }
  0x53   :  { %509 = vmatpush.bf16.msra.mxu1 %v470_v0 }
  0x56   :  { %491 = vmatpush.bf16.msra.mxu0 %v452_v28  ;;  %v1193_v28 = vld [vmem:[#allocation15_spill] sm:$0xff] }
  0x57   :  { %510 = vmatpush.bf16.msra.mxu1 %v468_v34 }
  0x94   :  { %v169_v35 = vpop.f32.mrf.mxu0  ;;  %v198_v39 = vpop.f32.mrf.mxu1 }
  0x95   :  { %226 = vmatmul.f32.vlgmr.msra.gmra.mxu2 %v169_v35  ;;  %255 = vmatmul.f32.vlgmr.msra.gmra.mxu3 %v198_v39 }
  0x96   :  { %284 = vmatmul.f32.vlgmr.msrb.gmra.mxu0 %v169_v35  ;;  %313 = vmatmul.f32.vlgmr.msrb.gmra.mxu1 %v198_v39 }
  0x97   :  { %541 = vmatpush.bf16.msrb.mxu1 %v858_v23  ;;  %522 = vmatpush.bf16.msrb.mxu0 %v856_v22 }
  0x9b   :  { %542 = vmatpush.bf16.msrb.mxu1 %v880_v36  ;;  %523 = vmatpush.bf16.msrb.mxu0 %v872_v32 }
  0x9c   :  { %v172_v0 = vpop.f32.mrf.mxu0  ;;  %v201_v18 = vpop.f32.mrf.mxu1 }
  0x9d   :  { %229 = vmatmul.f32.gmra.mxu2 %v172_v0  ;;  %258 = vmatmul.f32.gmra.mxu3 %v201_v18 }
  0x9e   :  { %287 = vmatmul.f32.gmra.mxu0 %v172_v0  ;;  %316 = vmatmul.f32.gmra.mxu1 %v201_v18  ;;  %v1194_v0 = vld [vmem:[#allocation16_spill] sm:$0xff] }
  0x9f   :  { %543 = vmatpush.bf16.msrb.mxu1 %v894_v46  ;;  %524 = vmatpush.bf16.msrb.mxu0 %v892_v45 }
  0xa3   :  { %544 = vmatpush.bf16.msrb.mxu1 %v914_v59  ;;  %525 = vmatpush.bf16.msrb.mxu0 %v912_v58 }
  0xa4   :  { %v175_v10 = vpop.f32.mrf.mxu0  ;;  %v204_v17 = vpop.f32.mrf.mxu1 }
  0xa5   :  { %232 = vmatmul.f32.gmra.mxu2 %v175_v10  ;;  %261 = vmatmul.f32.gmra.mxu3 %v204_v17 }
  0xa6   :  { %290 = vmatmul.f32.gmra.mxu0 %v175_v10  ;;  %319 = vmatmul.f32.gmra.mxu1 %v204_v17  ;;  %v1195_v10 = vld [vmem:[#allocation12_spill] sm:$0xff] }
  0xa7   :  { %545 = vmatpush.bf16.msrb.mxu1 %v938_v29  ;;  %526 = vmatpush.bf16.msrb.mxu0 %v932_v20 }
  0xab   :  { %546 = vmatpush.bf16.msrb.mxu1 %v954_v31  ;;  %527 = vmatpush.bf16.msrb.mxu0 %v952_v38 }
  0xac   :  { %v178_v41 = vpop.f32.mrf.mxu0  ;;  %v207_v47 = vpop.f32.mrf.mxu1 }
  0xad   :  { %235 = vmatmul.f32.gmra.mxu2 %v178_v41  ;;  %264 = vmatmul.f32.gmra.mxu3 %v207_v47 }
  0xae   :  { %293 = vmatmul.f32.gmra.mxu0 %v178_v41  ;;  %322 = vmatmul.f32.gmra.mxu1 %v207_v47  ;;  %v774_v47 = vmov 1.0|1.0  }
  0xaf   :  { %547 = vmatpush.bf16.msrb.mxu1 %v974_v1  ;;  %528 = vmatpush.bf16.msrb.mxu0 %v972_v2 }
  0xb3   :  { %548 = vmatpush.bf16.msrb.mxu1 %v1064_v51  ;;  %529 = vmatpush.bf16.msrb.mxu0 %v1061_v48 }
 0x113   :  { %v285_v52 = vpop.f32.mrf.mxu0  ;;  %v314_v54 = vpop.f32.mrf.mxu1 }
 0x114   :  { %v315_v53 = vadd.f32 %v314_v54, %v285_v52 }
 0x116   :  { %v1075_v4 = vsub.f32 %v829_v7, %v315_v53 }
 0x118   :  { %v227_v57 = vpop.f32.mrf.mxu2  ;;  %v256_v60 = vpop.f32.mrf.mxu3  ;;  %v335_v39 = vand.u32 2147483647, %v1075_v4 }
 0x119   :  { %v257_v12 = vadd.f32 %v256_v60, %v227_v57  ;;  %v1196_v60 = vld [vmem:[#allocation17_spill] sm:$0xff] }
 0x11a   :  { %vm343_vm5 = vcmp.gt.f32.partialorder %v335_v39, 0.039215688  ;;  %v351_v39 = vmul.f32 0.5, %v1075_v4 }
 0x11b   :  { %v288_v63 = vpop.f32.mrf.mxu0  ;;  %v317_v8 = vpop.f32.mrf.mxu1  ;;  %v326_v18 = vsub.f32 %v1194_v0, %v257_v12 }
 0x11c   :  { %v318_v42 = vadd.f32 %v317_v8, %v288_v63 }
 0x11d   :  { %v334_v57 = vand.u32 2147483647, %v326_v18 }
 0x11e   :  { %v1072_v61 = vsub.f32 %v823_v5, %v318_v42 }
 0x11f   :  { %vm342_vm11 = vcmp.gt.f32.partialorder %v334_v57, 0.039215688 }
 0x120   :  { %v230_v19 = vpop.f32.mrf.mxu2  ;;  %v259_v26 = vpop.f32.mrf.mxu3  ;;  %v337_v27 = vand.u32 2147483647, %v1072_v61 }
 0x121   :  { %v260_v13 = vadd.f32 %v259_v26, %v230_v19 }
 0x122   :  { %vm345_vm4 = vcmp.gt.f32.partialorder %v337_v27, 0.039215688 }
 0x123   :  { %v291_v9 = vpop.f32.mrf.mxu0  ;;  %v320_v33 = vpop.f32.mrf.mxu1  ;;  %v1087_v34 = vsub.f32 %v1193_v28, %v260_v13  ;;  %vm636_vm6 = vmpackc.low %vm345_vm4, %vm343_vm5 }
 0x124   :  { %v321_v37 = vadd.f32 %v320_v33, %v291_v9 }
 0x125   :  { %v336_v54 = vand.u32 2147483647, %v1087_v34 }
 0x126   :  { %v1069_v55 = vsub.f32 %v819_v3, %v321_v37 }
 0x127   :  { %vm344_vm10 = vcmp.gt.f32.partialorder %v336_v54, 0.039215688 }
 0x128   :  { %v233_v43 = vpop.f32.mrf.mxu2  ;;  %v262_v50 = vpop.f32.mrf.mxu3  ;;  %v339_v25 = vand.u32 2147483647, %v1069_v55  ;;  %vm630_vm12 = vmpackc.low %vm344_vm10, %vm342_vm11 }
 0x129   :  { %v263_v56 = vadd.f32 %v262_v50, %v233_v43 }
 0x12a   :  { %vm347_vm1 = vcmp.gt.f32.partialorder %v339_v25, 0.039215688 }
 0x12b   :  { %v294_v40 = vpop.f32.mrf.mxu0  ;;  %v323_v44 = vpop.f32.mrf.mxu1  ;;  %v1082_v15 = vsub.f32 %v1192_v11, %v263_v56 }
 0x12c   :  { %v324_v62 = vadd.f32 %v323_v44, %v294_v40  ;;  %v355_v40 = vmul.f32 0.5, %v1069_v55 }
 0x12d   :  { %v338_v41 = vand.u32 2147483647, %v1082_v15  ;;  %v354_v26 = vmul.f32 0.5, %v1082_v15 }
 0x12e   :  { %v1078_v14 = vsub.f32 %v1191_v6, %v324_v62  ;;  %v363_v15 = vadd.f32 %v355_v40, %v819_v3 }
 0x12f   :  { %vm346_vm7 = vcmp.gt.f32.partialorder %v338_v41, 0.039215688  ;;  %v362_v50 = vadd.f32 %v354_v26, %v1192_v11 }
 0x130   :  { %v236_v16 = vpop.f32.mrf.mxu2  ;;  %v265_v21 = vpop.f32.mrf.mxu3  ;;  %v341_v24 = vand.u32 2147483647, %v1078_v14  ;;  %v371_v55 = vmax.f32 %v363_v15, 0.0 }
 0x131   :  { %v266_v35 = vadd.f32 %v265_v21, %v236_v16  ;;  %v370_v12 = vmax.f32 %v362_v50, 0.0 }
 0x132   :  { %vm349_vm2 = vcmp.gt.f32.partialorder %v341_v24, 0.039215688  ;;  %v379_v54 = vmin.f32 %v371_v55, 255.0 }
 0x133   :  { %v1092_v17 = vsub.f32 %v1195_v10, %v266_v35  ;;  %vm634_vm3 = vmpackc.low %vm349_vm2, %vm347_vm1  ;;  %v357_v35 = vmul.f32 0.5, %v1078_v14 }
 0x134   :  { %635 = vmatpush.bf16.msk.msrb.mxu3 %vm634_vm3, %v774_v47  ;;  %v565_v4 = vsub.f32 %v379_v54, %v819_v3 }
 0x135   :  { %v340_v52 = vand.u32 2147483647, %v1092_v17  ;;  %v356_v62 = vmul.f32 0.5, %v1092_v17 }
 0x137   :  { %vm348_vm8 = vcmp.gt.f32.partialorder %v340_v52, 0.039215688  ;;  %v364_v24 = vadd.f32 %v356_v62, %v1195_v10 }
 0x138   :  { %637 = vmatpush.bf16.msk.msrb.mxu3 %vm636_vm6, %v774_v47  ;;  %vm628_vm9 = vmpackc.low %vm348_vm8, %vm346_vm7 }
 0x139   :  { %629 = vmatpush.bf16.msk.msrb.mxu2 %vm628_vm9, %v774_v47  ;;  %v372_v41 = vmax.f32 %v364_v24, 0.0 }
 0x13b   :  { %638 = vmatmul.msk.bf16.vlgmr.msrb.gmra.mxu3 %vm139_vm0, %v1196_v60  ;;  %v380_v14 = vmin.f32 %v372_v41, 255.0 }
 0x13c   :  { %648 = vmatpush.bf16.msra.mxu3 %v858_v23  ;;  %v383_v23 = vpack.c.bf16 %v984_v49, %v948_v30  ;;  %v352_v49 = vmul.f32 0.5, %v1087_v34  ;;  %v378_v34 = vmin.f32 %v370_v12, 255.0 }
 0x13d   :  { %631 = vmatpush.bf16.msk.msrb.mxu2 %vm630_vm12, %v774_v47  ;;  %v365_v47 = vadd.f32 %v357_v35, %v1191_v6 }
 0x13e   :  { %v360_v63 = vadd.f32 %v352_v49, %v1193_v28  ;;  %v564_v17 = vsub.f32 %v378_v34, %v1192_v11 }
 0x140   :  { %649 = vmatpush.bf16.msra.mxu3 %v880_v36  ;;  %632 = vmatmul.msk.bf16.vlgmr.msrb.gmra.mxu2 %vm139_vm0, %v1196_v60  ;;  %v368_v37 = vmax.f32 %v360_v63, 0.0  ;;  %v359_v60 = vadd.f32 %v351_v39, %v829_v7 }
 0x141   :  { %640 = vmatpush.bf16.msra.mxu2 %v856_v22 }
 0x142   :  { %v376_v56 = vmin.f32 %v368_v37, 255.0 }
 0x144   :  { %650 = vmatpush.bf16.msra.mxu3 %v894_v46  ;;  %v562_v25 = vsub.f32 %v376_v56, %v1193_v28 }
 0x145   :  { %641 = vmatpush.bf16.msra.mxu2 %v872_v32 }
 0x148   :  { %651 = vmatpush.bf16.msra.mxu3 %v914_v59 }
 0x149   :  { %642 = vmatpush.bf16.msra.mxu2 %v892_v45 }
 0x14b   :  { %639 = vmatmul.msk.bf16.gmra.mxu3 %vm139_vm0, %v383_v23 }
 0x14c   :  { %652 = vmatpush.bf16.msra.mxu3 %v938_v29 }
 0x14d   :  { %643 = vmatpush.bf16.msra.mxu2 %v912_v58 }
 0x150   :  { %653 = vmatpush.bf16.msra.mxu3 %v954_v31  ;;  %633 = vmatmul.msk.bf16.gmra.mxu2 %vm139_vm0, %v383_v23 }
 0x151   :  { %644 = vmatpush.bf16.msra.mxu2 %v932_v20 }
 0x154   :  { %654 = vmatpush.bf16.msra.mxu3 %v974_v1 }
 0x155   :  { %645 = vmatpush.bf16.msra.mxu2 %v952_v38 }
 0x158   :  { %655 = vmatpush.bf16.msra.mxu3 %v1064_v51 }
 0x159   :  { %646 = vmatpush.bf16.msra.mxu2 %v972_v2  ;;  %v350_v2 = vmul.f32 0.5, %v326_v18 }
 0x15b   :  { %v358_v38 = vadd.f32 %v350_v2, %v1194_v0 }
 0x15d   :  { %647 = vmatpush.bf16.msra.mxu2 %v1061_v48  ;;  %v366_v48 = vmax.f32 %v358_v38, 0.0 }
 0x15f   :  { %v374_v8 = vmin.f32 %v366_v48, 255.0 }
 0x161   :  { %v560_v33 = vsub.f32 %v374_v8, %v1194_v0 }
 0x1be   :  { %v438_v22 = vpop.f32.mrf.mxu3 }
 0x1c3   :  { %v419_v30 = vpop.f32.mrf.mxu2 }
 0x1c6   :  { %v440_v32 = vpop.f32.mrf.mxu3 }
 0x1c7   :  { %v449_v36 = vpack.c.bf16 %v440_v32, %v438_v22  ;;  %v373_v32 = vmax.f32 %v365_v47, 0.0 }
 0x1c9   :  { %511 = vmatmul.bf16.vlgmr.msra.gmra.mxu1 %v449_v36 }
 0x1cb   :  { %v421_v31 = vpop.f32.mrf.mxu2 }
 0x1cc   :  { %v448_v45 = vpack.c.bf16 %v421_v31, %v419_v30  ;;  %v367_v31 = vmax.f32 %v359_v60, 0.0 }
 0x1ce   :  { %v443_v46 = vpop.f32.mrf.mxu3  ;;  %492 = vmatmul.bf16.vlgmr.msra.gmra.mxu0 %v448_v45  ;;  %v375_v49 = vmin.f32 %v367_v31, 255.0 }
 0x1d3   :  { %v424_v58 = vpop.f32.mrf.mxu2 }
 0x1d6   :  { %v445_v59 = vpop.f32.mrf.mxu3 }
 0x1d7   :  { %v451_v1 = vpack.c.bf16 %v445_v59, %v443_v46  ;;  %v566_v59 = vsub.f32 %v380_v14, %v1195_v10 }
 0x1d9   :  { %516 = vmatmul.bf16.gmra.mxu1 %v451_v1  ;;  %554 = vmatmul.bf16.vlgmr.msra.gmra.mxu3 %v451_v1 }
 0x1db   :  { %v426_v20 = vpop.f32.mrf.mxu2 }
 0x1dc   :  { %v450_v29 = vpack.c.bf16 %v426_v20, %v424_v58 }
 0x1de   :  { %497 = vmatmul.bf16.gmra.mxu0 %v450_v29  ;;  %535 = vmatmul.bf16.vlgmr.msra.gmra.mxu2 %v450_v29  ;;  %v381_v29 = vmin.f32 %v373_v32, 255.0 }
 0x1e9   :  { %549 = vmatmul.bf16.vlgmr.msrb.gmra.mxu1 %v449_v36 }
 0x1ee   :  { %530 = vmatmul.bf16.vlgmr.msrb.gmra.mxu0 %v448_v45  ;;  %v353_v45 = vmul.f32 0.5, %v1072_v61  ;;  %v567_v61 = vsub.f32 %v381_v29, %v1191_v6 }
 0x246   :  { %v512_v51 = vpop.f32.mrf.mxu1 }
 0x24b   :  { %v493_v19 = vpop.f32.mrf.mxu0 }
 0x24c   :  { %v513_v9 = vadd.f32 %v512_v51, %v493_v19 }
 0x24e   :  { %v568_v42 = vmul.f32 %v560_v33, %v513_v9  ;;  %v514_v43 = vpop.f32.mrf.mxu1 }
 0x250   :  { %v576_v53 = vadd.f32 %v568_v42, %v1194_v0 }
 0x252   :  { %584 = vst [vmem:[#allocation8] sm:$0xff] %v576_v53 }
 0x253   :  { %v495_v44 = vpop.f32.mrf.mxu0 }
 0x254   :  { %v515_v13 = vadd.f32 %v514_v43, %v495_v44 }
 0x256   :  { %v570_v16 = vmul.f32 %v562_v25, %v515_v13  ;;  %v517_v21 = vpop.f32.mrf.mxu1 }
 0x258   :  { %v578_v27 = vadd.f32 %v570_v16, %v1193_v28 }
 0x25a   :  { %586 = vst [vmem:[#allocation8 + $0x10] sm:$0xff] %v578_v27 }
 0x25b   :  { %v498_v0 = vpop.f32.mrf.mxu0 }
 0x25c   :  { %v518_v18 = vadd.f32 %v517_v21, %v498_v0  ;;  %v555_v57 = vpop.f32.mrf.mxu3 }
 0x25e   :  { %v572_v52 = vmul.f32 %v564_v17, %v518_v18  ;;  %v519_v28 = vpop.f32.mrf.mxu1 }
 0x260   :  { %v580_v23 = vadd.f32 %v572_v52, %v1192_v11  ;;  %v361_v11 = vadd.f32 %v353_v45, %v823_v5 }
 0x261   :  { %v536_v22 = vpop.f32.mrf.mxu2 }
 0x262   :  { %588 = vst [vmem:[#allocation8 + $0x20] sm:$0xff] %v580_v23  ;;  %v556_v30 = vadd.f32 %v555_v57, %v536_v22  ;;  %v369_v9 = vmax.f32 %v361_v11, 0.0 }
 0x263   :  { %v500_v36 = vpop.f32.mrf.mxu0 }
 0x264   :  { %v573_v46 = vmul.f32 %v565_v4, %v556_v30  ;;  %v520_v58 = vadd.f32 %v519_v28, %v500_v36  ;;  %v557_v38 = vpop.f32.mrf.mxu3  ;;  %v377_v42 = vmin.f32 %v369_v9, 255.0 }
 0x266   :  { %v581_v1 = vadd.f32 %v573_v46, %v819_v3  ;;  %v574_v20 = vmul.f32 %v566_v59, %v520_v58  ;;  %v550_v48 = vpop.f32.mrf.mxu1  ;;  %v561_v3 = vsub.f32 %v375_v49, %v829_v7  ;;  %v563_v56 = vsub.f32 %v377_v42, %v823_v5 }
 0x268   :  { %589 = vst [vmem:[#allocation8 + $0x28] sm:$0xff] %v581_v1  ;;  %v582_v2 = vadd.f32 %v574_v20, %v1195_v10 }
 0x269   :  { %v538_v51 = vpop.f32.mrf.mxu2 }
 0x26a   :  { %590 = vst [vmem:[#allocation8 + $0x30] sm:$0xff] %v582_v2  ;;  %v558_v63 = vadd.f32 %v557_v38, %v538_v51 }
 0x26b   :  { %v531_v8 = vpop.f32.mrf.mxu0 }
 0x26c   :  { %v575_v19 = vmul.f32 %v567_v61, %v558_v63  ;;  %v551_v26 = vadd.f32 %v550_v48, %v531_v8 }
 0x26e   :  { %v583_v33 = vadd.f32 %v575_v19, %v1191_v6  ;;  %v569_v37 = vmul.f32 %v561_v3, %v551_v26  ;;  %v552_v43 = vpop.f32.mrf.mxu1 }
 0x270   :  { %591 = vst [vmem:[#allocation8 + $0x38] sm:$0xff] %v583_v33  ;;  %v577_v10 = vadd.f32 %v569_v37, %v829_v7 }
 0x272   :  { %585 = vst [vmem:[#allocation8 + $0x8] sm:$0xff] %v577_v10 }
 0x273   :  { %v533_v50 = vpop.f32.mrf.mxu0 }
 0x274   :  { %v553_v53 = vadd.f32 %v552_v43, %v533_v50 }
 0x276   :  { %v571_v40 = vmul.f32 %v563_v56, %v553_v53 }
 0x278   :  { %v579_v6 = vadd.f32 %v571_v40, %v823_v5 }
 0x27a   :  { %587 = vst [vmem:[#allocation8 + $0x18] sm:$0xff] %v579_v6 }
 0x27b   :  { %604 = dma.vmem_to_hbm [thread:$0]  %s597_s29, 1024, %s599_s5, [#allocation4], %s771_s24, %s771_s24, %s772_s25  }
 0x27c   :  { %765 = dma.done.wait [#allocation4], 1024  }
 0x27d   :  { %766 = vsyncadd [#allocation4], 4294966272 }
 0x27e   :  { %609 = vsyncpa [#allocation3], 1 }
 0x27f   :  { %610 = vsyncpa [#allocation6], 1 }
 0x280   :  { %611 = vsyncpa [#allocation4], 1 }

</bundles_post_ra>
